<compile_context>
chip_gen: v6e
topology: v6e:2x2x1
jax: 0.10.0
libtpu: 0.0.40
codegen_flags: <defaults>
</compile_context>

<pallas_src>
import functools
import math

import numpy as np
import jax
import jax.numpy as jnp
from jax.experimental import pallas as pl
from jax.experimental.pallas import tpu as pltpu


def _softplus(x):
    # numerically stable softplus for BCEWithLogits
    return jnp.maximum(x, 0.0) + jnp.log(1.0 + jnp.exp(-jnp.abs(x)))


def _loss_kernel(mel_len_ref, text_len_ref, pres_ref,          # (Bt,1,1) int32 VMEM
                 pred_mel_ref, post_mel_ref, gt_mel_ref,       # (Bt, n_mel, mel_T)
                 gate_out_ref, gate_tgt_ref,                   # (Bt, 1, mel_T)
                 att_ref,                                      # (Bt, mel_T, enc_T)
                 out_ref,                                      # (1, 8, 128)
                 *, pos_weight, sigma, exp_dtype):
    bt, n_mel, mel_T = pred_mel_ref.shape
    enc_T = att_ref.shape[-1]

    olen_i = mel_len_ref[...]                                  # (Bt,1,1) int32
    ilen_i = text_len_ref[...]                                 # (Bt,1,1) int32
    sel_v = (pres_ref[...] == 0).astype(jnp.float32)           # pres_prev_state == 0.0

    # mel tensors arrive in whatever dtype the model produced (bf16 preferred);
    # accumulate in f32.
    pred_mel = pred_mel_ref[...].astype(jnp.float32)
    post_mel = post_mel_ref[...].astype(jnp.float32)
    gt_mel = gt_mel_ref[...].astype(jnp.float32)

    # ---- masked MSE / MFSE partial sums (mask applied AFTER the mel reduce) --
    t_idx = jax.lax.broadcasted_iota(jnp.int32, (bt, 1, mel_T), 2)
    tmask = (t_idx < olen_i).astype(jnp.float32)               # (Bt,1,mel_T)

    d_spec = pred_mel - gt_mel                                 # (Bt,n_mel,mel_T)
    d_post = post_mel - gt_mel
    ss_spec = jnp.sum(d_spec * d_spec, axis=1, keepdims=True)  # (Bt,1,mel_T)
    ss_post = jnp.sum(d_post * d_post, axis=1, keepdims=True)
    rs_spec = jnp.sum(jnp.abs(d_spec), axis=1, keepdims=True)
    rs_post = jnp.sum(jnp.abs(d_post), axis=1, keepdims=True)

    sse_spec = jnp.sum(ss_spec * tmask)                        # spec_MSE numerator
    sse_post = jnp.sum(ss_post * tmask)
    rssq_spec = jnp.sum(rs_spec * rs_spec * tmask)             # spec_MFSE numerator
    rssq_post = jnp.sum(rs_post * rs_post * tmask)

    # ---- gate BCEWithLogits (pos_weight), summed over all frames (no masking
    #      in the PyTorch reference) ------------------------------------------
    x = gate_out_ref[...].astype(jnp.float32)
    z = gate_tgt_ref[...].astype(jnp.float32)
    gate_sum = jnp.sum(pos_weight * z * _softplus(-x) + (1.0 - z) * _softplus(x))

    # ---- guided (diagonal) attention loss numerator --------------------------
    #   diag = sum_t mo * ( sum_e att*mi - sum_e att*mi*exp(-(a-b)^2) )
    # with 1/(sigma*sqrt(2)) folded into the 1-D factors a,b so no divides or
    # constant multiplies hit the (Bt,mel_T,enc_T) slab.
    att = att_ref[...].astype(jnp.float32)                     # (Bt, mel_T, enc_T)
    olen_f = jnp.maximum(olen_i.astype(jnp.float32), 1.0)      # guard 1/0
    ilen_f = jnp.maximum(ilen_i.astype(jnp.float32), 1.0)
    scale = 1.0 / (sigma * math.sqrt(2.0))
    inv_olen = scale / olen_f                                  # (Bt,1,1)
    inv_ilen = scale / ilen_f

    gx_i = jax.lax.broadcasted_iota(jnp.int32, (1, mel_T, 1), 1)   # output idx
    gy_i = jax.lax.broadcasted_iota(jnp.int32, (1, 1, enc_T), 2)   # input  idx
    a = gy_i.astype(jnp.float32) * inv_ilen                    # (Bt, 1, enc_T)
    b = gx_i.astype(jnp.float32) * inv_olen                    # (Bt, mel_T, 1)

    mi = (gy_i < ilen_i).astype(jnp.float32)                   # (Bt, 1, enc_T)
    p = att * mi                                               # full slab, shared by both terms
    d = (a - b).astype(exp_dtype)                              # bf16 exp on v6e/v7x, f32 on v5e
    e = jnp.exp(-(d * d))                                      # EUP
    pe = p * e                                                 # promotes back to f32

    r_all = jnp.sum(p, axis=2, keepdims=True)                  # (Bt, mel_T, 1)
    r_exp = jnp.sum(pe, axis=2, keepdims=True)
    mo = (gx_i < olen_i).astype(jnp.float32) * sel_v           # (Bt, mel_T, 1)
    diag_sum = jnp.sum((r_all - r_exp) * mo)

    # ---- pack the 6 block-partial sums (lane-broadcast rows of (8,128)) -----
    # wrapper reads lane 0 of rows 0..5
    # TODO(synk): an (nblk, 8) SMEM-spaced output would drop these full-vreg selects.
    row = jax.lax.broadcasted_iota(jnp.int32, (8, 128), 0)
    packed = jnp.where(row == 0, sse_spec, 0.0)
    packed = jnp.where(row == 1, sse_post, packed)
    packed = jnp.where(row == 2, rssq_spec, packed)
    packed = jnp.where(row == 3, rssq_post, packed)
    packed = jnp.where(row == 4, gate_sum, packed)
    packed = jnp.where(row == 5, diag_sum, packed)
    out_ref[...] = packed[None]


def _round_up(x, m):
    return ((x + m - 1) // m) * m


def _hw_config():
    """Trace-time hardware query: VMEM budget, core count, bf16-EUP support."""
    kind = ""
    try:
        kind = jax.devices()[0].device_kind.lower()
    except Exception:
        pass

    if "v7" in kind:
        cap, cores, bf16_eup = 64 << 20, 2, True
    elif "v6" in kind:
        cap, cores, bf16_eup = 128 << 20, 1, True
    elif "v5p" in kind:
        cap, cores, bf16_eup = 128 << 20, 2, False
    elif "v5" in kind:                                  # v5e / v5 lite
        cap, cores, bf16_eup = 128 << 20, 1, False
    elif "v4" in kind:
        cap, cores, bf16_eup = 128 << 20, 2, False
    else:                                               # unknown: be conservative
        cap, cores, bf16_eup = 64 << 20, 2, False

    try:  # prefer the real VMEM capacity when the query is available
        info = pltpu.get_tpu_info()
        for attr in ("vmem_capacity_bytes", "vmem_size_bytes", "vmem_bytes"):
            v = getattr(info, attr, None)
            if v:
                cap = int(v)
                break
    except Exception:
        pass

    budget = int(cap * 0.625)                           # working-set budget (~40/80 MiB)
    limit = max(budget, min(int(cap * 0.78), cap - (8 << 20)))
    return {"vmem_budget": budget, "vmem_limit": limit,
            "num_cores": cores, "bf16_eup": bf16_eup}


def _per_sample_vmem_bytes(n_mel, mel_T, enc_T, mel_bytes, gate_bytes, att_bytes):
    """Rough per-sample VMEM footprint (double-buffered DMA + f32 temporaries)."""
    melp = _round_up(mel_T, 128)
    encp = _round_up(enc_T, 128)
    n_melp = _round_up(n_mel, 8)
    dma = 2 * (3 * n_melp * melp * mel_bytes            # 3 mel slabs
               + 2 * melp * gate_bytes                  # 2 gate rows
               + melp * encp * att_bytes                # alignments
               + 3 * 128 * 4)                           # length vectors (padded)
    tmp = 4 * (3 * n_melp * melp                        # f32 upcasts / diffs
               + 3 * melp * encp                        # att*mi, exp term, product
               + 8 * melp)                              # row sums / masks
    return dma + tmp


def _pick_block_batch(B, per_sample_bytes, vmem_budget, num_cores):
    """Largest Bt dividing B whose working set fits the VMEM budget.
    On multi-TC chips prefer an even number of grid steps (keeps both cores fed);
    on single-TC chips nblk=1 (fewest, biggest steps) is allowed."""
    fits = [bt for bt in range(1, B + 1)
            if B % bt == 0 and bt * per_sample_bytes <= vmem_budget]
    if not fits:
        return 1
    if num_cores > 1:
        even = [bt for bt in fits if (B // bt) % num_cores == 0]
        if even:
            return max(even)
    return max(fits)


def _run_loss_kernel(pred_mel, post_mel, gt_mel, gate_out, gate_tgt, alignments,
                     mel_lengths, text_lengths, pres_prev_state,
                     pos_weight, sigma):
    B, n_mel, mel_T = gt_mel.shape
    enc_T = alignments.shape[-1]
    gate_out3 = gate_out.reshape(B, 1, mel_T)
    gate_tgt3 = gate_tgt.reshape(B, 1, mel_T)
    mel_len3 = mel_lengths.reshape(B, 1, 1).astype(jnp.int32)
    text_len3 = text_lengths.reshape(B, 1, 1).astype(jnp.int32)
    pres3 = pres_prev_state.reshape(B, 1, 1).astype(jnp.int32)

    hw = _hw_config()
    per_sample = _per_sample_vmem_bytes(
        n_mel, mel_T, enc_T,
        gt_mel.dtype.itemsize, gate_out3.dtype.itemsize, alignments.dtype.itemsize)
    bt = _pick_block_batch(B, per_sample, hw["vmem_budget"], hw["num_cores"])
    nblk = B // bt
    exp_dtype = jnp.bfloat16 if hw["bf16_eup"] else jnp.float32

    len_spec = pl.BlockSpec((bt, 1, 1), lambda nb: (nb, 0, 0))
    mel_spec = pl.BlockSpec((bt, n_mel, mel_T), lambda nb: (nb, 0, 0))
    gate_spec = pl.BlockSpec((bt, 1, mel_T), lambda nb: (nb, 0, 0))
    att_spec = pl.BlockSpec((bt, mel_T, enc_T), lambda nb: (nb, 0, 0))
    # TODO(synk): if an xprof trace shows exposed DMA on the alignments stream,
    # add pipeline_mode=pl.Buffered(3) to att_spec (check the 64 MiB budget on v7x).

    grid_spec = pltpu.PrefetchScalarGridSpec(
        num_scalar_prefetch=0,
        grid=(nblk,),
        in_specs=[len_spec, len_spec, len_spec,
                  mel_spec, mel_spec, mel_spec,
                  gate_spec, gate_spec, att_spec],
        out_specs=pl.BlockSpec((1, 8, 128), lambda nb: (nb, 0, 0)),
    )

    # advisory cost estimate — this call is HBM-bandwidth bound
    def _nbytes(t):
        return int(np.prod(t.shape)) * t.dtype.itemsize
    bytes_accessed = sum(_nbytes(t) for t in
                         (pred_mel, post_mel, gt_mel, gate_out3, gate_tgt3,
                          alignments, mel_len3, text_len3, pres3))
    bytes_accessed += nblk * 8 * 128 * 4
    flops = 14 * B * n_mel * mel_T + 8 * B * mel_T * enc_T + 12 * B * mel_T
    transcendentals = B * mel_T * enc_T + 2 * B * mel_T

    kernel = functools.partial(_loss_kernel, pos_weight=float(pos_weight),
                               sigma=float(sigma), exp_dtype=exp_dtype)
    return pl.pallas_call(
        kernel,
        out_shape=jax.ShapeDtypeStruct((nblk, 8, 128), jnp.float32),
        grid_spec=grid_spec,
        compiler_params=pltpu.CompilerParams(
            dimension_semantics=("parallel",),
            vmem_limit_bytes=int(hw["vmem_limit"])),
        cost_estimate=pl.CostEstimate(flops=int(flops),
                                      transcendentals=int(transcendentals),
                                      bytes_accessed=int(bytes_accessed)),
    )(mel_len3, text_len3, pres3,
      pred_mel, post_mel, gt_mel, gate_out3, gate_tgt3, alignments)


class Tacotron2LossPallas:
    """JAX/Pallas port of Tacotron2Loss.forward (core differentiable losses)."""

    def __init__(self, hparams):
        self.pos_weight = float(hparams['gate_positive_weight'])
        self.sigma = float(hparams['DiagonalGuidedAttention_sigma'])
        self.weights = {
            'spec_MSE': hparams['spec_MSE_weight'],
            'spec_MFSE': hparams['spec_MFSE_weight'],
            'postnet_MSE': hparams['postnet_MSE_weight'],
            'postnet_MFSE': hparams['postnet_MFSE_weight'],
            'gate_loss': hparams['gate_loss_weight'],
            'sylps_kld': hparams['sylps_kld_weight'],
            'sylps_MSE': hparams['sylps_MSE_weight'],
            'sylps_MAE': hparams['sylps_MAE_weight'],
            'diag_att': hparams['diag_att_weight'],
        }

    def __call__(self, pred, gt, loss_scalars=None):
        loss_scalars = loss_scalars or {}
        gt_mel = gt['gt_mel']
        B, n_mel, mel_T = gt_mel.shape
        mel_lengths = gt['mel_lengths'].astype(jnp.int32)
        text_lengths = gt['text_lengths'].astype(jnp.int32)
        pres_prev_state = gt['pres_prev_state'].astype(jnp.int32)

        # NOTE: inputs are passed through in their native dtype (bf16 model
        # outputs are NOT up-cast to f32 here) — the kernel accumulates in f32.
        sums = _run_loss_kernel(
            pred['pred_mel'], pred['pred_mel_postnet'], gt_mel,
            pred['pred_gate_logits'], gt['gt_gate_logits'], pred['alignments'],
            mel_lengths, text_lengths, pres_prev_state,
            self.pos_weight, self.sigma)

        tot = jnp.sum(sums[:, :, 0], axis=0)              # (8,)
        sum_len = jnp.sum(mel_lengths).astype(jnp.float32)
        n_valid = sum_len * n_mel

        loss_dict = {}
        loss_dict['spec_MSE'] = tot[0] / n_valid
        loss_dict['postnet_MSE'] = tot[1] / n_valid
        loss_dict['spec_MFSE'] = tot[2] / (sum_len * n_mel * n_mel)
        loss_dict['postnet_MFSE'] = tot[3] / (sum_len * n_mel * n_mel)
        loss_dict['gate_loss'] = tot[4] / (B * mel_T)

        diag_denom = jnp.sum(
            mel_lengths * (pres_prev_state == 0).astype(jnp.int32)
        ).astype(jnp.float32)
        diag_denom = jnp.maximum(diag_denom, 1.0)          # guard all-excluded batch
        loss_dict['diag_att'] = tot[5] / diag_denom

        # ---- tiny O(B) scalar glue in plain JAX ----
        syl_mu = pred['pred_sylps_mu'].astype(jnp.float32)
        syl_logvar = pred['pred_sylps_logvar'].astype(jnp.float32)
        loss_dict['sylps_kld'] = (-0.5 * jnp.sum(
            1.0 + syl_logvar - jnp.exp(syl_logvar) - syl_mu ** 2)) / B
        pred_sylps = pred['pred_sylps'].squeeze(1).astype(jnp.float32)
        gt_sylps = gt['gt_sylps'].astype(jnp.float32)
        loss_dict['sylps_MAE'] = jnp.mean(jnp.abs(pred_sylps - gt_sylps))
        loss_dict['sylps_MSE'] = jnp.mean((pred_sylps - gt_sylps) ** 2)

        # ---- colate_losses (weighted sum) ----
        loss = None
        for k, v in loss_dict.items():
            scale = loss_scalars.get(f'{k}_weight', self.weights.get(k, 1.0))
            if scale > 0.0:
                loss = v * scale if loss is None else loss + v * scale
        loss_dict['loss'] = loss

        # TODO(synk): res_enc / dbGAN / InfGAN losses need external discriminator
        # modules (resGAN/dbGAN/infGAN) that are not part of this module.
        # TODO(synk): alignment_metric / get_first_over_thresh based diagnostics
        # (diagonality, weighted_score) and per-file host bookkeeping are omitted.
        return loss_dict, {}


def _reference_losses(pred, gt, pos_weight, sigma):
    """Pure-JAX f32 reference for the kernel-computed terms (demo tolerance check)."""
    gt_mel = gt['gt_mel'].astype(jnp.float32)
    pm = pred['pred_mel'].astype(jnp.float32)
    pp = pred['pred_mel_postnet'].astype(jnp.float32)
    B, n_mel, mel_T = gt_mel.shape
    olen = gt['mel_lengths'].astype(jnp.int32)
    ilen = gt['text_lengths'].astype(jnp.int32)
    mask = (jnp.arange(mel_T)[None, None, :] < olen[:, None, None]).astype(jnp.float32)
    sum_len = jnp.sum(olen).astype(jnp.float32)

    e = (pm - gt_mel) * mask
    ep = (pp - gt_mel) * mask
    out = {}
    out['spec_MSE'] = jnp.sum(e * e) / (sum_len * n_mel)
    out['postnet_MSE'] = jnp.sum(ep * ep) / (sum_len * n_mel)
    rs = jnp.sum(jnp.abs(e), axis=1)
    rsp = jnp.sum(jnp.abs(ep), axis=1)
    out['spec_MFSE'] = jnp.sum(rs * rs) / (sum_len * n_mel * n_mel)
    out['postnet_MFSE'] = jnp.sum(rsp * rsp) / (sum_len * n_mel * n_mel)

    x = pred['pred_gate_logits'].astype(jnp.float32)
    z = gt['gt_gate_logits'].astype(jnp.float32)
    sp = lambda v: jnp.maximum(v, 0.0) + jnp.log1p(jnp.exp(-jnp.abs(v)))
    out['gate_loss'] = jnp.mean(pos_weight * z * sp(-x) + (1.0 - z) * sp(x))

    att = pred['alignments'].astype(jnp.float32)
    enc_T = att.shape[-1]
    gx = jnp.arange(mel_T, dtype=jnp.float32)[None, :, None]
    gy = jnp.arange(enc_T, dtype=jnp.float32)[None, None, :]
    o = jnp.maximum(olen.astype(jnp.float32), 1.0)[:, None, None]
    i = jnp.maximum(ilen.astype(jnp.float32), 1.0)[:, None, None]
    w = 1.0 - jnp.exp(-((gy / i - gx / o) ** 2) / (2.0 * sigma ** 2))
    mo = (gx < o).astype(jnp.float32)
    mi = (gy < i).astype(jnp.float32)
    sel = (gt['pres_prev_state'] == 0).astype(jnp.float32)[:, None, None]
    num = jnp.sum(w * att * mo * mi * sel)
    den = jnp.maximum(jnp.sum(olen * (gt['pres_prev_state'] == 0)).astype(jnp.float32), 1.0)
    out['diag_att'] = num / den
    return out


if __name__ == "__main__":
    key = jax.random.PRNGKey(0)
    # lane-dense test shapes (mel_T, enc_T multiples of 128), still small
    B, n_mel, mel_T, enc_T = 4, 16, 128, 128

    k = jax.random.split(key, 10)
    gt_mel_f32 = jax.random.normal(k[0], (B, n_mel, mel_T), jnp.float32)
    pred_mel_f32 = gt_mel_f32 + 0.1 * jax.random.normal(k[1], (B, n_mel, mel_T), jnp.float32)
    pred_post_f32 = gt_mel_f32 + 0.05 * jax.random.normal(k[2], (B, n_mel, mel_T), jnp.float32)

    # model outputs / targets fed to the kernel in bf16 (halves HBM traffic)
    gt_mel = gt_mel_f32.astype(jnp.bfloat16)
    pred_mel = pred_mel_f32.astype(jnp.bfloat16)
    pred_mel_postnet = pred_post_f32.astype(jnp.bfloat16)

    mel_lengths = jnp.array([128, 96, 64, 120], jnp.int32)
    text_lengths = jnp.array([100, 70, 40, 90], jnp.int32)
    pres_prev_state = jnp.array([0, 0, 1, 0], jnp.int32)

    t = jnp.arange(mel_T)[None, :]
    gt_gate_logits = (t == (mel_lengths[:, None] - 1)).astype(jnp.float32)  # target probs
    pred_gate_logits = jax.random.normal(k[3], (B, mel_T), jnp.float32)

    alignments = jax.nn.softmax(
        jax.random.normal(k[4], (B, mel_T, enc_T), jnp.float32), axis=-1
    ).astype(jnp.bfloat16)

    pred_sylps_mu = 0.1 * jax.random.normal(k[5], (B,), jnp.float32)
    pred_sylps_logvar = 0.1 * jax.random.normal(k[6], (B,), jnp.float32)
    pred_sylps = 3.0 + jax.random.normal(k[7], (B, 1), jnp.float32)
    gt_sylps = 3.0 + jax.random.normal(k[8], (B,), jnp.float32)

    hparams = dict(
        gate_positive_weight=10.0,
        DiagonalGuidedAttention_sigma=0.4,
        spec_MSE_weight=1.0, spec_MFSE_weight=1.0,
        postnet_MSE_weight=1.0, postnet_MFSE_weight=1.0,
        gate_loss_weight=1.0,
        sylps_kld_weight=0.02, sylps_MSE_weight=0.01, sylps_MAE_weight=0.05,
        diag_att_weight=0.05,
    )

    pred = dict(pred_mel=pred_mel, pred_mel_postnet=pred_mel_postnet,
                pred_gate_logits=pred_gate_logits, alignments=alignments,
                pred_sylps_mu=pred_sylps_mu, pred_sylps_logvar=pred_sylps_logvar,
                pred_sylps=pred_sylps)
    gt = dict(gt_mel=gt_mel, mel_lengths=mel_lengths, text_lengths=text_lengths,
              gt_gate_logits=gt_gate_logits, gt_sylps=gt_sylps,
              pres_prev_state=pres_prev_state)

    loss_fn = Tacotron2LossPallas(hparams)
    loss_dict, _ = loss_fn(pred, gt)
    total = jax.block_until_ready(loss_dict['loss'])
    assert bool(jnp.isfinite(total)), "loss is not finite"

    # tolerance-check the kernel-computed terms against a pure-JAX f32 reference
    # (bf16 exp on v6e/v7x and accumulation order cause tiny deltas)
    ref = _reference_losses(pred, gt, hparams['gate_positive_weight'],
                            hparams['DiagonalGuidedAttention_sigma'])
    for name, want in ref.items():
        got = float(loss_dict[name])
        want = float(want)
        assert abs(got - want) <= 2e-2 * max(1.0, abs(want)) + 1e-4, (name, got, want)

    print("KERNEL_OK")
</pallas_src>

<mosaic_0001>
module attributes {stable_mosaic.version = 11 : i64} {
  func.func @_loss_kernel(%arg0: i32, %arg1: memref<2x1x1xi32, #tpu.memory_space<vmem>>, %arg2: memref<2x1x1xi32, #tpu.memory_space<vmem>>, %arg3: memref<2x1x1xi32, #tpu.memory_space<vmem>>, %arg4: memref<2x16x128xbf16, #tpu.memory_space<vmem>>, %arg5: memref<2x16x128xbf16, #tpu.memory_space<vmem>>, %arg6: memref<2x16x128xbf16, #tpu.memory_space<vmem>>, %arg7: memref<2x1x128xf32, #tpu.memory_space<vmem>>, %arg8: memref<2x1x128xf32, #tpu.memory_space<vmem>>, %arg9: memref<2x128x128xbf16, #tpu.memory_space<vmem>>, %arg10: memref<1x8x128xf32, #tpu.memory_space<vmem>>) attributes {dimension_semantics = [#tpu.dimension_semantics<parallel>], iteration_bounds = array<i64: 2>, scalar_prefetch = 0 : i64, scratch_operands = 0 : i64, tpu.core_type = #tpu.core_type<tc>, window_params = [{transform_indices = @transform_0, window_bounds = array<i64: 2, 1, 1>}, {transform_indices = @transform_1, window_bounds = array<i64: 2, 1, 1>}, {transform_indices = @transform_2, window_bounds = array<i64: 2, 1, 1>}, {transform_indices = @transform_3, window_bounds = array<i64: 2, 16, 128>}, {transform_indices = @transform_4, window_bounds = array<i64: 2, 16, 128>}, {transform_indices = @transform_5, window_bounds = array<i64: 2, 16, 128>}, {transform_indices = @transform_6, window_bounds = array<i64: 2, 1, 128>}, {transform_indices = @transform_7, window_bounds = array<i64: 2, 1, 128>}, {transform_indices = @transform_8, window_bounds = array<i64: 2, 128, 128>}, {transform_indices = @transform_9, window_bounds = array<i64: 1, 8, 128>}]} {
    %c0 = arith.constant 0 : index
    %c0_0 = arith.constant 0 : index
    %c0_1 = arith.constant 0 : index
    %0 = vector.load %arg1[%c0, %c0_0, %c0_1] : memref<2x1x1xi32, #tpu.memory_space<vmem>>, vector<2x1x1xi32>
    %c0_2 = arith.constant 0 : index
    %c0_3 = arith.constant 0 : index
    %c0_4 = arith.constant 0 : index
    %1 = vector.load %arg2[%c0_2, %c0_3, %c0_4] : memref<2x1x1xi32, #tpu.memory_space<vmem>>, vector<2x1x1xi32>
    %c0_5 = arith.constant 0 : index
    %c0_6 = arith.constant 0 : index
    %c0_7 = arith.constant 0 : index
    %2 = vector.load %arg3[%c0_5, %c0_6, %c0_7] : memref<2x1x1xi32, #tpu.memory_space<vmem>>, vector<2x1x1xi32>
    %c0_i32 = arith.constant 0 : i32
    %3 = vector.broadcast %c0_i32 : i32 to vector<2x1x1xi32>
    %4 = arith.cmpi eq, %2, %3 : vector<2x1x1xi32>
    %5 = arith.extui %4 : vector<2x1x1xi1> to vector<2x1x1xi32>
    %6 = arith.sitofp %5 : vector<2x1x1xi32> to vector<2x1x1xf32>
    %c0_8 = arith.constant 0 : index
    %c0_9 = arith.constant 0 : index
    %c0_10 = arith.constant 0 : index
    %7 = vector.load %arg4[%c0_8, %c0_9, %c0_10] : memref<2x16x128xbf16, #tpu.memory_space<vmem>>, vector<2x16x128xbf16>
    %8 = arith.extf %7 : vector<2x16x128xbf16> to vector<2x16x128xf32>
    %c0_11 = arith.constant 0 : index
    %c0_12 = arith.constant 0 : index
    %c0_13 = arith.constant 0 : index
    %9 = vector.load %arg5[%c0_11, %c0_12, %c0_13] : memref<2x16x128xbf16, #tpu.memory_space<vmem>>, vector<2x16x128xbf16>
    %10 = arith.extf %9 : vector<2x16x128xbf16> to vector<2x16x128xf32>
    %c0_14 = arith.constant 0 : index
    %c0_15 = arith.constant 0 : index
    %c0_16 = arith.constant 0 : index
    %11 = vector.load %arg6[%c0_14, %c0_15, %c0_16] : memref<2x16x128xbf16, #tpu.memory_space<vmem>>, vector<2x16x128xbf16>
    %12 = arith.extf %11 : vector<2x16x128xbf16> to vector<2x16x128xf32>
    %13 = tpu.iota {dimensions = array<i32: 2>} : vector<2x1x128xi32>
    %14 = vector.broadcast %0 : vector<2x1x1xi32> to vector<2x1x128xi32>
    %15 = arith.cmpi slt, %13, %14 : vector<2x1x128xi32>
    %16 = arith.extui %15 : vector<2x1x128xi1> to vector<2x1x128xi32>
    %17 = arith.sitofp %16 : vector<2x1x128xi32> to vector<2x1x128xf32>
    %18 = arith.subf %8, %12 : vector<2x16x128xf32>
    %19 = arith.subf %10, %12 : vector<2x16x128xf32>
    %20 = arith.mulf %18, %18 : vector<2x16x128xf32>
    %cst = arith.constant dense<0.000000e+00> : vector<2x128xf32>
    %21 = vector.multi_reduction <add>, %20, %cst [1] : vector<2x16x128xf32> to vector<2x128xf32>
    %22 = vector.shape_cast %21 : vector<2x128xf32> to vector<2x1x128xf32>
    %23 = arith.mulf %19, %19 : vector<2x16x128xf32>
    %cst_17 = arith.constant dense<0.000000e+00> : vector<2x128xf32>
    %24 = vector.multi_reduction <add>, %23, %cst_17 [1] : vector<2x16x128xf32> to vector<2x128xf32>
    %25 = vector.shape_cast %24 : vector<2x128xf32> to vector<2x1x128xf32>
    %26 = math.absf %18 : vector<2x16x128xf32>
    %cst_18 = arith.constant dense<0.000000e+00> : vector<2x128xf32>
    %27 = vector.multi_reduction <add>, %26, %cst_18 [1] : vector<2x16x128xf32> to vector<2x128xf32>
    %28 = vector.shape_cast %27 : vector<2x128xf32> to vector<2x1x128xf32>
    %29 = math.absf %19 : vector<2x16x128xf32>
    %cst_19 = arith.constant dense<0.000000e+00> : vector<2x128xf32>
    %30 = vector.multi_reduction <add>, %29, %cst_19 [1] : vector<2x16x128xf32> to vector<2x128xf32>
    %31 = vector.shape_cast %30 : vector<2x128xf32> to vector<2x1x128xf32>
    %32 = arith.mulf %22, %17 : vector<2x1x128xf32>
    %33 = vector.shape_cast %32 : vector<2x1x128xf32> to vector<1x2x1x128xf32>
    %cst_20 = arith.constant dense<0.000000e+00> : vector<1xf32>
    %34 = vector.multi_reduction <add>, %33, %cst_20 [1, 2, 3] : vector<1x2x1x128xf32> to vector<1xf32>
    %35 = vector.shape_cast %34 : vector<1xf32> to vector<1x1x1x1xf32>
    %36 = vector.extract %35[0, 0, 0, 0] : f32 from vector<1x1x1x1xf32>
    %37 = arith.mulf %25, %17 : vector<2x1x128xf32>
    %38 = vector.shape_cast %37 : vector<2x1x128xf32> to vector<1x2x1x128xf32>
    %cst_21 = arith.constant dense<0.000000e+00> : vector<1xf32>
    %39 = vector.multi_reduction <add>, %38, %cst_21 [1, 2, 3] : vector<1x2x1x128xf32> to vector<1xf32>
    %40 = vector.shape_cast %39 : vector<1xf32> to vector<1x1x1x1xf32>
    %41 = vector.extract %40[0, 0, 0, 0] : f32 from vector<1x1x1x1xf32>
    %42 = arith.mulf %28, %28 : vector<2x1x128xf32>
    %43 = arith.mulf %42, %17 : vector<2x1x128xf32>
    %44 = vector.shape_cast %43 : vector<2x1x128xf32> to vector<1x2x1x128xf32>
    %cst_22 = arith.constant dense<0.000000e+00> : vector<1xf32>
    %45 = vector.multi_reduction <add>, %44, %cst_22 [1, 2, 3] : vector<1x2x1x128xf32> to vector<1xf32>
    %46 = vector.shape_cast %45 : vector<1xf32> to vector<1x1x1x1xf32>
    %47 = vector.extract %46[0, 0, 0, 0] : f32 from vector<1x1x1x1xf32>
    %48 = arith.mulf %31, %31 : vector<2x1x128xf32>
    %49 = arith.mulf %48, %17 : vector<2x1x128xf32>
    %50 = vector.shape_cast %49 : vector<2x1x128xf32> to vector<1x2x1x128xf32>
    %cst_23 = arith.constant dense<0.000000e+00> : vector<1xf32>
    %51 = vector.multi_reduction <add>, %50, %cst_23 [1, 2, 3] : vector<1x2x1x128xf32> to vector<1xf32>
    %52 = vector.shape_cast %51 : vector<1xf32> to vector<1x1x1x1xf32>
    %53 = vector.extract %52[0, 0, 0, 0] : f32 from vector<1x1x1x1xf32>
    %c0_24 = arith.constant 0 : index
    %c0_25 = arith.constant 0 : index
    %c0_26 = arith.constant 0 : index
    %54 = vector.load %arg7[%c0_24, %c0_25, %c0_26] : memref<2x1x128xf32, #tpu.memory_space<vmem>>, vector<2x1x128xf32>
    %c0_27 = arith.constant 0 : index
    %c0_28 = arith.constant 0 : index
    %c0_29 = arith.constant 0 : index
    %55 = vector.load %arg8[%c0_27, %c0_28, %c0_29] : memref<2x1x128xf32, #tpu.memory_space<vmem>>, vector<2x1x128xf32>
    %cst_30 = arith.constant 1.000000e+01 : f32
    %56 = vector.broadcast %cst_30 : f32 to vector<2x1x128xf32>
    %57 = arith.mulf %56, %55 : vector<2x1x128xf32>
    %cst_31 = arith.constant 0.000000e+00 : f32
    %58 = vector.broadcast %cst_31 : f32 to vector<2x1x128xf32>
    %59 = arith.subf %58, %54 : vector<2x1x128xf32>
    %cst_32 = arith.constant 0.000000e+00 : f32
    %60 = vector.broadcast %cst_32 : f32 to vector<2x1x128xf32>
    %61 = arith.maximumf %59, %60 : vector<2x1x128xf32>
    %62 = math.absf %59 : vector<2x1x128xf32>
    %cst_33 = arith.constant 0.000000e+00 : f32
    %63 = vector.broadcast %cst_33 : f32 to vector<2x1x128xf32>
    %64 = arith.subf %63, %62 : vector<2x1x128xf32>
    %65 = math.exp %64 : vector<2x1x128xf32>
    %cst_34 = arith.constant 1.000000e+00 : f32
    %66 = vector.broadcast %cst_34 : f32 to vector<2x1x128xf32>
    %67 = arith.addf %66, %65 : vector<2x1x128xf32>
    %68 = math.log %67 : vector<2x1x128xf32>
    %69 = arith.addf %61, %68 : vector<2x1x128xf32>
    %70 = arith.mulf %57, %69 : vector<2x1x128xf32>
    %cst_35 = arith.constant 1.000000e+00 : f32
    %71 = vector.broadcast %cst_35 : f32 to vector<2x1x128xf32>
    %72 = arith.subf %71, %55 : vector<2x1x128xf32>
    %cst_36 = arith.constant 0.000000e+00 : f32
    %73 = vector.broadcast %cst_36 : f32 to vector<2x1x128xf32>
    %74 = arith.maximumf %54, %73 : vector<2x1x128xf32>
    %75 = math.absf %54 : vector<2x1x128xf32>
    %cst_37 = arith.constant 0.000000e+00 : f32
    %76 = vector.broadcast %cst_37 : f32 to vector<2x1x128xf32>
    %77 = arith.subf %76, %75 : vector<2x1x128xf32>
    %78 = math.exp %77 : vector<2x1x128xf32>
    %cst_38 = arith.constant 1.000000e+00 : f32
    %79 = vector.broadcast %cst_38 : f32 to vector<2x1x128xf32>
    %80 = arith.addf %79, %78 : vector<2x1x128xf32>
    %81 = math.log %80 : vector<2x1x128xf32>
    %82 = arith.addf %74, %81 : vector<2x1x128xf32>
    %83 = arith.mulf %72, %82 : vector<2x1x128xf32>
    %84 = arith.addf %70, %83 : vector<2x1x128xf32>
    %85 = vector.shape_cast %84 : vector<2x1x128xf32> to vector<1x2x1x128xf32>
    %cst_39 = arith.constant dense<0.000000e+00> : vector<1xf32>
    %86 = vector.multi_reduction <add>, %85, %cst_39 [1, 2, 3] : vector<1x2x1x128xf32> to vector<1xf32>
    %87 = vector.shape_cast %86 : vector<1xf32> to vector<1x1x1x1xf32>
    %88 = vector.extract %87[0, 0, 0, 0] : f32 from vector<1x1x1x1xf32>
    %c0_40 = arith.constant 0 : index
    %c0_41 = arith.constant 0 : index
    %c0_42 = arith.constant 0 : index
    %89 = vector.load %arg9[%c0_40, %c0_41, %c0_42] : memref<2x128x128xbf16, #tpu.memory_space<vmem>>, vector<2x128x128xbf16>
    %90 = arith.extf %89 : vector<2x128x128xbf16> to vector<2x128x128xf32>
    %91 = arith.sitofp %0 : vector<2x1x1xi32> to vector<2x1x1xf32>
    %cst_43 = arith.constant 1.000000e+00 : f32
    %92 = vector.broadcast %cst_43 : f32 to vector<2x1x1xf32>
    %93 = arith.maximumf %91, %92 : vector<2x1x1xf32>
    %94 = arith.sitofp %1 : vector<2x1x1xi32> to vector<2x1x1xf32>
    %cst_44 = arith.constant 1.000000e+00 : f32
    %95 = vector.broadcast %cst_44 : f32 to vector<2x1x1xf32>
    %96 = arith.maximumf %94, %95 : vector<2x1x1xf32>
    %cst_45 = arith.constant 1.76776695 : f32
    %97 = vector.broadcast %cst_45 : f32 to vector<2x1x1xf32>
    %98 = arith.divf %97, %93 : vector<2x1x1xf32>
    %cst_46 = arith.constant 1.76776695 : f32
    %99 = vector.broadcast %cst_46 : f32 to vector<2x1x1xf32>
    %100 = arith.divf %99, %96 : vector<2x1x1xf32>
    %101 = tpu.iota {dimensions = array<i32: 1>} : vector<1x128x1xi32>
    %102 = tpu.iota {dimensions = array<i32: 2>} : vector<1x1x128xi32>
    %103 = arith.sitofp %102 : vector<1x1x128xi32> to vector<1x1x128xf32>
    %104 = vector.broadcast %103 : vector<1x1x128xf32> to vector<2x1x128xf32>
    %105 = vector.broadcast %100 : vector<2x1x1xf32> to vector<2x1x128xf32>
    %106 = arith.mulf %104, %105 : vector<2x1x128xf32>
    %107 = arith.sitofp %101 : vector<1x128x1xi32> to vector<1x128x1xf32>
    %108 = vector.broadcast %107 : vector<1x128x1xf32> to vector<2x128x1xf32>
    %109 = vector.broadcast %98 : vector<2x1x1xf32> to vector<2x128x1xf32>
    %110 = arith.mulf %108, %109 : vector<2x128x1xf32>
    %111 = vector.broadcast %102 : vector<1x1x128xi32> to vector<2x1x128xi32>
    %112 = vector.broadcast %1 : vector<2x1x1xi32> to vector<2x1x128xi32>
    %113 = arith.cmpi slt, %111, %112 : vector<2x1x128xi32>
    %114 = arith.extui %113 : vector<2x1x128xi1> to vector<2x1x128xi32>
    %115 = arith.sitofp %114 : vector<2x1x128xi32> to vector<2x1x128xf32>
    %116 = vector.broadcast %115 : vector<2x1x128xf32> to vector<2x128x128xf32>
    %117 = arith.mulf %90, %116 : vector<2x128x128xf32>
    %118 = vector.broadcast %106 : vector<2x1x128xf32> to vector<2x128x128xf32>
    %119 = vector.broadcast %110 : vector<2x128x1xf32> to vector<2x128x128xf32>
    %120 = arith.subf %118, %119 : vector<2x128x128xf32>
    %121 = arith.mulf %120, %120 : vector<2x128x128xf32>
    %cst_47 = arith.constant 0.000000e+00 : f32
    %122 = vector.broadcast %cst_47 : f32 to vector<2x128x128xf32>
    %123 = arith.subf %122, %121 : vector<2x128x128xf32>
    %124 = math.exp %123 : vector<2x128x128xf32>
    %125 = arith.mulf %117, %124 : vector<2x128x128xf32>
    %cst_48 = arith.constant dense<0.000000e+00> : vector<2x128xf32>
    %126 = vector.multi_reduction <add>, %117, %cst_48 [2] : vector<2x128x128xf32> to vector<2x128xf32>
    %127 = vector.shape_cast %126 : vector<2x128xf32> to vector<2x128x1xf32>
    %cst_49 = arith.constant dense<0.000000e+00> : vector<2x128xf32>
    %128 = vector.multi_reduction <add>, %125, %cst_49 [2] : vector<2x128x128xf32> to vector<2x128xf32>
    %129 = vector.shape_cast %128 : vector<2x128xf32> to vector<2x128x1xf32>
    %130 = vector.broadcast %101 : vector<1x128x1xi32> to vector<2x128x1xi32>
    %131 = vector.broadcast %0 : vector<2x1x1xi32> to vector<2x128x1xi32>
    %132 = arith.cmpi slt, %130, %131 : vector<2x128x1xi32>
    %133 = arith.extui %132 : vector<2x128x1xi1> to vector<2x128x1xi32>
    %134 = arith.sitofp %133 : vector<2x128x1xi32> to vector<2x128x1xf32>
    %135 = vector.broadcast %6 : vector<2x1x1xf32> to vector<2x128x1xf32>
    %136 = arith.mulf %134, %135 : vector<2x128x1xf32>
    %137 = arith.subf %127, %129 : vector<2x128x1xf32>
    %138 = arith.mulf %137, %136 : vector<2x128x1xf32>
    %139 = vector.shape_cast %138 : vector<2x128x1xf32> to vector<1x2x128x1xf32>
    %cst_50 = arith.constant dense<0.000000e+00> : vector<1xf32>
    %140 = vector.multi_reduction <add>, %139, %cst_50 [1, 2, 3] : vector<1x2x128x1xf32> to vector<1xf32>
    %141 = vector.shape_cast %140 : vector<1xf32> to vector<1x1x1x1xf32>
    %142 = vector.extract %141[0, 0, 0, 0] : f32 from vector<1x1x1x1xf32>
    %143 = tpu.iota {dimensions = array<i32: 0>} : vector<8x128xi32>
    %c0_i32_51 = arith.constant 0 : i32
    %144 = vector.broadcast %c0_i32_51 : i32 to vector<8x128xi32>
    %145 = arith.cmpi eq, %143, %144 : vector<8x128xi32>
    %cst_52 = arith.constant 0.000000e+00 : f32
    %146 = vector.broadcast %36 : f32 to vector<8x128xf32>
    %147 = vector.broadcast %cst_52 : f32 to vector<8x128xf32>
    %148 = arith.select %145, %146, %147 : vector<8x128xi1>, vector<8x128xf32>
    %c1_i32 = arith.constant 1 : i32
    %149 = vector.broadcast %c1_i32 : i32 to vector<8x128xi32>
    %150 = arith.cmpi eq, %143, %149 : vector<8x128xi32>
    %151 = vector.broadcast %41 : f32 to vector<8x128xf32>
    %152 = arith.select %150, %151, %148 : vector<8x128xi1>, vector<8x128xf32>
    %c2_i32 = arith.constant 2 : i32
    %153 = vector.broadcast %c2_i32 : i32 to vector<8x128xi32>
    %154 = arith.cmpi eq, %143, %153 : vector<8x128xi32>
    %155 = vector.broadcast %47 : f32 to vector<8x128xf32>
    %156 = arith.select %154, %155, %152 : vector<8x128xi1>, vector<8x128xf32>
    %c3_i32 = arith.constant 3 : i32
    %157 = vector.broadcast %c3_i32 : i32 to vector<8x128xi32>
    %158 = arith.cmpi eq, %143, %157 : vector<8x128xi32>
    %159 = vector.broadcast %53 : f32 to vector<8x128xf32>
    %160 = arith.select %158, %159, %156 : vector<8x128xi1>, vector<8x128xf32>
    %c4_i32 = arith.constant 4 : i32
    %161 = vector.broadcast %c4_i32 : i32 to vector<8x128xi32>
    %162 = arith.cmpi eq, %143, %161 : vector<8x128xi32>
    %163 = vector.broadcast %88 : f32 to vector<8x128xf32>
    %164 = arith.select %162, %163, %160 : vector<8x128xi1>, vector<8x128xf32>
    %c5_i32 = arith.constant 5 : i32
    %165 = vector.broadcast %c5_i32 : i32 to vector<8x128xi32>
    %166 = arith.cmpi eq, %143, %165 : vector<8x128xi32>
    %167 = vector.broadcast %142 : f32 to vector<8x128xf32>
    %168 = arith.select %166, %167, %164 : vector<8x128xi1>, vector<8x128xf32>
    %169 = vector.shape_cast %168 : vector<8x128xf32> to vector<1x8x128xf32>
    %c0_53 = arith.constant 0 : index
    %c0_54 = arith.constant 0 : index
    %c0_55 = arith.constant 0 : index
    %170 = vector.load %arg10[%c0_53, %c0_54, %c0_55] : memref<1x8x128xf32, #tpu.memory_space<vmem>>, vector<1x8x128xf32>
    tpu.vector_store %arg10[%c0_53, %c0_54, %c0_55], %169 {strides = array<i32>} : memref<1x8x128xf32, #tpu.memory_space<vmem>>, vector<1x8x128xf32>,
    return
  }
  func.func @transform_0(%arg0: i32) -> (i32, i32, i32) {
    %c0_i32 = arith.constant 0 : i32
    %c0_i32_0 = arith.constant 0 : i32
    %c0_i32_1 = arith.constant 0 : i32
    return %arg0, %c0_i32, %c0_i32_0 : i32, i32, i32
  }
  func.func @transform_1(%arg0: i32) -> (i32, i32, i32) {
    %c0_i32 = arith.constant 0 : i32
    %c0_i32_0 = arith.constant 0 : i32
    %c0_i32_1 = arith.constant 0 : i32
    return %arg0, %c0_i32, %c0_i32_0 : i32, i32, i32
  }
  func.func @transform_2(%arg0: i32) -> (i32, i32, i32) {
    %c0_i32 = arith.constant 0 : i32
    %c0_i32_0 = arith.constant 0 : i32
    %c0_i32_1 = arith.constant 0 : i32
    return %arg0, %c0_i32, %c0_i32_0 : i32, i32, i32
  }
  func.func @transform_3(%arg0: i32) -> (i32, i32, i32) {
    %c0_i32 = arith.constant 0 : i32
    %c0_i32_0 = arith.constant 0 : i32
    %c0_i32_1 = arith.constant 0 : i32
    return %arg0, %c0_i32, %c0_i32_0 : i32, i32, i32
  }
  func.func @transform_4(%arg0: i32) -> (i32, i32, i32) {
    %c0_i32 = arith.constant 0 : i32
    %c0_i32_0 = arith.constant 0 : i32
    %c0_i32_1 = arith.constant 0 : i32
    return %arg0, %c0_i32, %c0_i32_0 : i32, i32, i32
  }
  func.func @transform_5(%arg0: i32) -> (i32, i32, i32) {
    %c0_i32 = arith.constant 0 : i32
    %c0_i32_0 = arith.constant 0 : i32
    %c0_i32_1 = arith.constant 0 : i32
    return %arg0, %c0_i32, %c0_i32_0 : i32, i32, i32
  }
  func.func @transform_6(%arg0: i32) -> (i32, i32, i32) {
    %c0_i32 = arith.constant 0 : i32
    %c0_i32_0 = arith.constant 0 : i32
    %c0_i32_1 = arith.constant 0 : i32
    return %arg0, %c0_i32, %c0_i32_0 : i32, i32, i32
  }
  func.func @transform_7(%arg0: i32) -> (i32, i32, i32) {
    %c0_i32 = arith.constant 0 : i32
    %c0_i32_0 = arith.constant 0 : i32
    %c0_i32_1 = arith.constant 0 : i32
    return %arg0, %c0_i32, %c0_i32_0 : i32, i32, i32
  }
  func.func @transform_8(%arg0: i32) -> (i32, i32, i32) {
    %c0_i32 = arith.constant 0 : i32
    %c0_i32_0 = arith.constant 0 : i32
    %c0_i32_1 = arith.constant 0 : i32
    return %arg0, %c0_i32, %c0_i32_0 : i32, i32, i32
  }
  func.func @transform_9(%arg0: i32) -> (i32, i32, i32) {
    %c0_i32 = arith.constant 0 : i32
    %c0_i32_0 = arith.constant 0 : i32
    %c0_i32_1 = arith.constant 0 : i32
    return %arg0, %c0_i32, %c0_i32_0 : i32, i32, i32
  }
}

</mosaic_0001>

<bundles_post_ra>
// kernel: tpu_custom_call.1
= control target key start
LH: loop header
LB: loop body
LE: loop exit
PB: predicated region body
PF: predicated region fallthrough
CT: control target
= control target key end

     0   :  { %s3669_s0 = inlined_call_operand.vmem [shape: s32[4,1,1], index: 0, kind: input, shape index: {}]   ;;  %s3670_s1 = inlined_call_operand.vmem [shape: s32[4,1,1], index: 1, kind: input, shape index: {}]   ;;  %s3671_s2 = inlined_call_operand.vmem [shape: s32[4,1,1], index: 2, kind: input, shape index: {}]   ;;  %s3672_s3 = inlined_call_operand.hbm [shape: bf16[4,16,128], index: 3, kind: input, shape index: {}]   ;;  %s3673_s4 = inlined_call_operand.hbm [shape: bf16[4,16,128], index: 4, kind: input, shape index: {}]   ;;  %s3674_s5 = inlined_call_operand.hbm [shape: bf16[4,16,128], index: 5, kind: input, shape index: {}]   ;;  %s3675_s6 = inlined_call_operand.vmem [shape: f32[4,1,128], index: 6, kind: input, shape index: {}]   ;;  %s3676_s7 = inlined_call_operand.vmem [shape: f32[4,1,128], index: 7, kind: input, shape index: {}]   ;;  %s3677_s8 = inlined_call_operand.hbm [shape: bf16[4,128,128], index: 8, kind: input, shape index: {}]   ;;  %s3678_s9 = inlined_call_operand.hbm [shape: f32[2,8,128], index: 9, kind: output, shape index: {}]  }
   0x1   :  { %3702 = sst [smem:[#allocation34_spill]] %s3672_s3 }
   0x2   :  { %3703 = sst [smem:[#allocation35_spill]] %s3673_s4 }
   0x3   :  { %3704 = sst [smem:[#allocation36_spill]] %s3678_s9 }
   0x4   :  { %14 = vsyncpa [#allocation3], 0 }
   0x5   :  { %16 = vsyncpa [#allocation3 + $0x1], 0 }
   0x6   :  { %17 = vsyncpa [#allocation6], 0 }
   0x7   :  { %19 = vsyncpa [#allocation6 + $0x1], 0 }
   0x8   :  { %20 = vsyncpa [#allocation9], 0 }
   0x9   :  { %22 = vsyncpa [#allocation9 + $0x1], 0 }
   0xa   :  { %23 = vsyncpa [#allocation4], 0 }
   0xb   :  { %25 = vsyncpa [#allocation4 + $0x1], 0  ;;  %s2643_s30 = smov 0   ;;  %s2645_s10 = smov 0  }
   0xc   :  { %s2647_s11 = smov 0   ;;  %s2649_s12 = smov 0  }
   0xd LB: > { %3705 = sst [smem:[#allocation15_spill]] %s2570_s30  ;;  %s2664_s13 = sadd.s32 4294967295, %s2582_s12   ;;  %s2582_s12 = sphi %s2649_s12, %s3760_s12   ;;  %s2578_s11 = sphi %s2647_s11, %s3762_s11   ;;  %s2574_s10 = sphi %s2645_s10, %s3764_s10   ;;  %s2570_s30 = sphi %s2643_s30, %s3763_s30  }
   0xe   : > { %3706 = sst [smem:[#allocation16_spill]] %s2578_s11  ;;  %s2043_s14 = sadd.s32 4294967294, %s2582_s12  }
   0xf   : > { %s2668_s15 = sadd.s32 1, %s2582_s12   ;;  %s116_s16 = sadd.s32 1, %s2578_s11 }
  0x10   : > { %3707 = sst [smem:[#allocation17_spill]] %s2668_s15  ;;  %s113_s17 = ssub.s32 %s2582_s12, %s2668_s15 }
  0x11   : > { %p123_p0 = scmp.ne.s32.totalorder %s2578_s11, %s2574_s10  ;;  %p114_p1 = scmp.eq.s32.totalorder %s113_s17, 0 }
  0x12   : > { %p124_p2 = scmp.eq.s32.totalorder %s2582_s12, 0  ;;  %p129_p3 = scmp.ne.s32.totalorder %s2574_s10, %s2570_s30 }
  0x13   : > { %p130_p4 = scmp.eq.s32.totalorder %s2664_s13, 0  ;;  %p283_p7 = scmp.eq.s32.totalorder %s2664_s13, 1 }
  0x14   : > { %s2680_s18 = scalar_select %p114_p1, %s2578_s11, %s116_s16  }
  0x15   : > { %p125_p5 = por %p124_p2, %p123_p0  ;;  %p2682_p6 = por %p130_p4, %p129_p3 }
  0x16   : > { %3708 = sst [smem:[#allocation18_spill]] %s2680_s18  ;;  %p289_p8 = scmp.eq.s32.totalorder %s2043_s14, 1 }
  0x17   : > { %s3709_s19 = scalar_select %p2682_p6, 1, 0 }
  0x18   : > { %p2268_p10 = scmp.lt.s32.totalorder %s2582_s12, 2  ;;  %p2689_p11 = por %p283_p7, %p123_p0 }
  0x19   : > { %p2693_p12 = por %p289_p8, %p129_p3  ;;  %s2698_s22 = sand.u32 1, %s2578_s11  }
  0x1a   : > { %s3710_s20 = scalar_select %p2689_p11, 1, 0 }
  0x1b   : > { %s3712_s21 = scalar_select %p2693_p12, 1, 0 }
  0x1c   : > { %3711 = sst [smem:[#allocation19_spill]] %s3710_s20  ;;  %s2701_s23 = sshll.u32 %s2582_s12, 8 }
  0x1d   : > { %3713 = sst [smem:[#allocation20_spill]] %s3712_s21  ;;  %s2704_s24 = sshll.u32 %s2698_s22, 4 }
  0x1e   : > { %p2706_p13 = pnand %p2268_p10, %p125_p5  ;;  %s355_s26 = sand.u32 1, %s2582_s12  }
  0x1f   : > { %s3715_s4 = sld [smem:[#allocation35_spill]]  ;;  %s359_s14 = scalar_lea.vmem [#allocation5], %s2704_s24 }
  0x20   : > { %s367_s16 = sshll.u32 %s359_s14, 4  ;;  %s2721_s17 = scalar_lea.sflag [#allocation6], %s355_s26  ;;  %s2718_s16 = int_to_ptr.vmem [resolvable:$true] %s367_s16 }
  0x21   : > { %p2727_p2 = pneg %p2706_p13 }
  0x25   : > { %s2715_s29 = scalar_lea.hbm %s3715_s4, %s2701_s23  ;;  %s2403_s14 = scalar_lea.hbm %s3715_s4, 512 }
  0x26   : > { %s2398_s18 = scalar_lea.hbm %s2715_s29, 256  ;;  %p2404_p5 = scmp.lt.s32.totalorder %s2715_s29, %s3715_s4 }
  0x27   : > { %p2399_p1 = scmp.ne.s32.totalorder %s2715_s29, %s2398_s18  ;;  %p2405_p7 = scmp.lt.s32.totalorder %s2403_s14, %s2398_s18 }
  0x29   : > { %p2401_p3 = pnand %p2727_p2, %p2399_p1  ;;  %p2406_p8 = por %p2405_p7, %p2404_p5 }
  0x2b   : > { %p2402_p4 = pneg %p2401_p3 }
  0x2d   : > { %p2407_p10 = pnand %p2406_p8, %p2402_p4 }
  0x2f   : > { %2410 = shalt.err (!%p2407_p10)
}
  0x30   : > { %s2411_s26 = scalar_lea.vmem %s2718_s16, 256  ;;  %s2584_s30 = smov [#allocation5]  }
  0x31   : > { %p2412_p9 = scmp.ne.s32.totalorder %s2718_s16, %s2411_s26  ;;  %s2416_s27 = sshll.u32 %s2584_s30, 4  ;;  %s2417_s27 = int_to_ptr.vmem [resolvable:$false] %s2416_s27 }
  0x32   : > { %s2418_s28 = scalar_lea.vmem %s2417_s27, 512  ;;  %p2419_p0 = scmp.lt.s32.totalorder %s2718_s16, %s2417_s27 }
  0x33   : > { %p2414_p1 = pnand %p2412_p9, %p2727_p2  ;;  %p2420_p12 = scmp.lt.s32.totalorder %s2418_s28, %s2411_s26 }
  0x35   : > { %p2415_p3 = pneg %p2414_p1  ;;  %p2421_p11 = por %p2420_p12, %p2419_p0 }
  0x37   : > { %p2422_p6 = pnand %p2421_p11, %p2415_p3 }
  0x39   : > { %2425 = shalt.err (!%p2422_p6)
}
  0x3a   : > { %s3686_s15 = smov 64   ;;  %s3688_s18 = smov 4  }
  0x3b   : > { %2257 = dma.hbm_to_vmem [thread:$0]  (!%p2706_p13), %s2715_s29, 256, %s2718_s16, %s2721_s17, %s3686_s15, %s3686_s15, %s3688_s18  }
  0x3c   : > { %p435_p9 = scmp.lt.s32.totalorder %s2582_s12, 3  ;;  %s3717_s3 = sld [smem:[#allocation34_spill]] }
  0x3d   : > { %p3718_p6 = scmp.ge.s32.totalorder %s2582_s12, 1  ;;  %s337_s27 = scalar_lea.vmem [#allocation2], %s2704_s24 }
  0x3e   : > { %s345_s28 = sshll.u32 %s337_s27, 4  ;;  %s334_s4 = scalar_lea.sflag [#allocation3], %s2698_s22  ;;  %s2767_s28 = int_to_ptr.vmem [resolvable:$true] %s345_s28 }
  0x3f   : > { %p2762_p11 = pnand %p3718_p6, %p435_p9 }
  0x41   : > { %s3719_s26 = scalar_select %p2762_p11, 1, 0 }
  0x42   : > { %s2758_s14 = scalar_lea.hbm %s3717_s3, %s2701_s23  ;;  %s2431_s21 = scalar_lea.hbm %s3717_s3, 512 }
  0x43   : > { %s2426_s29 = scalar_lea.hbm %s2758_s14, 256  ;;  %p2432_p5 = scmp.lt.s32.totalorder %s2758_s14, %s3717_s3 }
  0x44   : > { %p2427_p12 = scmp.ne.s32.totalorder %s2758_s14, %s2426_s29  ;;  %p2433_p7 = scmp.lt.s32.totalorder %s2431_s21, %s2426_s29 }
  0x46   : > { %p2429_p0 = pnand %p2427_p12, %p2727_p2  ;;  %p2434_p8 = por %p2433_p7, %p2432_p5 }
  0x48   : > { %p2430_p4 = pneg %p2429_p0 }
  0x4a   : > { %p2435_p10 = pnand %p2434_p8, %p2430_p4 }
  0x4c   : > { %2438 = shalt.err (!%p2435_p10)
}
  0x4d   : > { %s2439_s27 = scalar_lea.vmem %s2767_s28, 256  ;;  %s2587_s9 = smov [#allocation2]  }
  0x4e   : > { %p2440_p1 = scmp.ne.s32.totalorder %s2767_s28, %s2439_s27  ;;  %s2444_s16 = sshll.u32 %s2587_s9, 4  ;;  %s2445_s16 = int_to_ptr.vmem [resolvable:$false] %s2444_s16 }
  0x4f   : > { %s2446_s30 = scalar_lea.vmem %s2445_s16, 512  ;;  %p2447_p6 = scmp.lt.s32.totalorder %s2767_s28, %s2445_s16 }
  0x50   : > { %p2442_p3 = pnand %p2440_p1, %p2727_p2  ;;  %p2448_p12 = scmp.lt.s32.totalorder %s2446_s30, %s2439_s27 }
  0x52   : > { %p2443_p9 = pneg %p2442_p3  ;;  %p2449_p0 = por %p2448_p12, %p2447_p6 }
  0x54   : > { %p2450_p11 = pnand %p2449_p0, %p2443_p9 }
  0x56   : > { %2453 = shalt.err (!%p2450_p11)
}
  0x57   : > { %s3720_s15 = smov 4   ;;  %s3721_s18 = smov 64  }
  0x58   : > { %2254 = dma.hbm_to_vmem [thread:$0]  (!%p2706_p13), %s2758_s14, 256, %s2767_s28, %s334_s4, %s3721_s18, %s3721_s18, %s3720_s15  }
  0x59   : > { %s2797_s21 = scalar_lea.hbm %s3674_s5, %s2701_s23  ;;  %s381_s27 = scalar_lea.vmem [#allocation7], %s2704_s24 }
  0x5a   : > { %s389_s16 = sshll.u32 %s381_s27, 4  ;;  %s2454_s30 = scalar_lea.hbm %s2797_s21, 256  ;;  %s390_s16 = int_to_ptr.vmem [resolvable:$true] %s389_s16 }
  0x5b   : > { %p2455_p11 = scmp.ne.s32.totalorder %s2797_s21, %s2454_s30  ;;  %s2459_s4 = scalar_lea.hbm %s3674_s5, 512 }
  0x5c   : > { %p2460_p7 = scmp.lt.s32.totalorder %s2797_s21, %s3674_s5  ;;  %p2461_p8 = scmp.lt.s32.totalorder %s2459_s4, %s2454_s30 }
  0x5d   : > { %p2457_p4 = pnand %p2455_p11, %p2727_p2 }
  0x5e   : > { %p2462_p10 = por %p2461_p8, %p2460_p7 }
  0x5f   : > { %p2458_p5 = pneg %p2457_p4 }
  0x61   : > { %p2463_p1 = pnand %p2462_p10, %p2458_p5 }
  0x63   : > { %2466 = shalt.err (!%p2463_p1)
}
  0x64   : > { %s2467_s23 = scalar_lea.vmem %s390_s16, 256  ;;  %s2588_s24 = smov [#allocation7]  }
  0x65   : > { %p2468_p3 = scmp.ne.s32.totalorder %s390_s16, %s2467_s23  ;;  %s2472_s29 = sshll.u32 %s2588_s24, 4  ;;  %s2473_s29 = int_to_ptr.vmem [resolvable:$false] %s2472_s29 }
  0x66   : > { %s2474_s9 = scalar_lea.vmem %s2473_s29, 512  ;;  %p2475_p12 = scmp.lt.s32.totalorder %s390_s16, %s2473_s29 }
  0x67   : > { %p2470_p9 = pnand %p2468_p3, %p2727_p2  ;;  %p2476_p0 = scmp.lt.s32.totalorder %s2474_s9, %s2467_s23 }
  0x69   : > { %p2471_p6 = pneg %p2470_p9  ;;  %p2477_p11 = por %p2476_p0, %p2475_p12 }
  0x6b   : > { %p2478_p4 = pnand %p2477_p11, %p2471_p6 }
  0x6d   : > { %2481 = shalt.err (!%p2478_p4)
}
  0x6e   : > { %2260 = dma.hbm_to_vmem [thread:$0]  (!%p2706_p13), %s2797_s21, 256, %s390_s16, %s2721_s17, %s3721_s18, %s3721_s18, %s3720_s15  }
  0x6f   : > { %s2058_s3 = sshll.u32 %s2698_s22, 7  ;;  %s2122_s20 = sshll.u32 %s2582_s12, 11 }
  0x70   : > { %s2825_s4 = scalar_lea.hbm %s3677_s8, %s2122_s20  ;;  %s419_s14 = scalar_lea.vmem [#allocation8], %s2058_s3 }
  0x71   : > { %s427_s28 = sshll.u32 %s419_s14, 4  ;;  %s416_s23 = scalar_lea.sflag [#allocation9], %s2698_s22  ;;  %s2827_s28 = int_to_ptr.vmem [resolvable:$true] %s427_s28 }
  0x72   : > { %s2482_s24 = scalar_lea.hbm %s2825_s4, 2048  ;;  %s2487_s16 = scalar_lea.hbm %s3677_s8, 4096 }
  0x73   : > { %p2483_p5 = scmp.ne.s32.totalorder %s2825_s4, %s2482_s24  ;;  %p2488_p10 = scmp.lt.s32.totalorder %s2825_s4, %s3677_s8 }
  0x74   : > { %p2489_p1 = scmp.lt.s32.totalorder %s2487_s16, %s2482_s24 }
  0x75   : > { %p2485_p7 = pnand %p2483_p5, %p2727_p2 }
  0x76   : > { %p2490_p3 = por %p2489_p1, %p2488_p10 }
  0x77   : > { %p2486_p8 = pneg %p2485_p7 }
  0x79   : > { %p2491_p9 = pnand %p2490_p3, %p2486_p8 }
  0x7b   : > { %2494 = shalt.err (!%p2491_p9)
}
  0x7c   : > { %s2495_s22 = scalar_lea.vmem %s2827_s28, 2048  ;;  %s2589_s3 = smov [#allocation8]  }
  0x7d   : > { %p2496_p6 = scmp.ne.s32.totalorder %s2827_s28, %s2495_s22  ;;  %s2500_s20 = sshll.u32 %s2589_s3, 4  ;;  %s2501_s20 = int_to_ptr.vmem [resolvable:$false] %s2500_s20 }
  0x7e   : > { %s2502_s27 = scalar_lea.vmem %s2501_s20, 4096  ;;  %p2503_p11 = scmp.lt.s32.totalorder %s2827_s28, %s2501_s20 }
  0x7f   : > { %p2498_p12 = pnand %p2496_p6, %p2727_p2  ;;  %p2504_p4 = scmp.lt.s32.totalorder %s2502_s27, %s2495_s22 }
  0x81   : > { %p2499_p0 = pneg %p2498_p12  ;;  %p2505_p5 = por %p2504_p4, %p2503_p11 }
  0x83   : > { %p2506_p7 = pnand %p2505_p5, %p2499_p0 }
  0x85   : > { %2509 = shalt.err (!%p2506_p7)
}
  0x86   : > { %2263 = dma.hbm_to_vmem [thread:$0]  (!%p2706_p13), %s2825_s4, 2048, %s2827_s28, %s416_s23, %s3721_s18, %s3721_s18, %s3720_s15  }
  0x87   : > { %p3722_p2 = scmp.ne.s32.totalorder %s3719_s26, 0 }
  0x89   : > { %439 = sbr.rel (%p3722_p2) target bundleno = 868 (0x364), region = 56 }
  0x8e   : > { %s2856_s11 = sand.u32 1, %s2574_s10   ;;  %p3723_p8 = scmp.ne.s32.totalorder %s3709_s19, 0 }
  0x8f   : > { %s2859_s30 = sshll.u32 %s2856_s11, 4  ;;  %s442_s14 = scalar_lea.sflag [#allocation3], %s2856_s11 }
  0x90   : > { %s445_s25 = scalar_lea.vmem [#allocation2], %s2859_s30 }
  0x91   : > { %2553 = dma.done.wait (%p3723_p8), %s442_s14, 256  }
  0x92   : > { %2555 = vsyncadd (%p3723_p8), %s442_s14, 4294967040  ;;  %s450_s26 = sand.u32 1, %s2664_s13   ;;  %s454_s18 = scalar_lea.vmem [#allocation5], %s2859_s30 }
  0x93   : > { %s451_s15 = scalar_lea.sflag [#allocation6], %s450_s26 }
  0x94   : > { %2557 = dma.done.wait (%p3723_p8), %s451_s15, 512  }
  0x95   : > { %2559 = vsyncadd (%p3723_p8), %s451_s15, 4294966784  ;;  %s2066_s4 = sshll.u32 %s2856_s11, 7  ;;  %s463_s28 = scalar_lea.vmem [#allocation7], %s2859_s30 }
  0x96   : > { %s469_s23 = scalar_lea.sflag [#allocation9], %s2856_s11  ;;  %s2876_s24 = scalar_lea.vmem [#allocation8], %s2066_s4 }
  0x97   : > { %2561 = dma.done.wait (%p3723_p8), %s469_s23, 2048  }
  0x98   : > { %2563 = vsyncadd (%p3723_p8), %s469_s23, 4294965248  ;;  %s2068_s17 = sshll.u32 %s2664_s13, 1  ;;  %v2590_v0 = vmov 0   ;;  %v607_v10 = vlaneseq  ;;  %vm1756_vm7 = vcmask 7168   ;;  %s3753_s16 = sld [smem:[#allocation19_spill]] }
  0x99   : > { %2306 = vset.pattern.permute.xlu0 %v2590_v0  ;;  %p543_p13 = scmp.lt.s32.totalorder %s2068_s17, 3  ;;  %2307 = vset.pattern.permute.xlu1 %v2590_v0  ;;  %s1849_s26 = scalar_lea.sflag [#allocation4], %s2856_s11 }
  0x9a   : > { %v2900_v11 = vshrl.u32 %v607_v10, 7 }
  0x9b   : > { %s3766_s17 = smov (!%p543_p13, %s2068_s17), 3 }
  0x9c   : > { %s550_s29 = scalar_lea.vmem %s3670_s1, %s3766_s17  ;;  %s2893_s3 = scalar_lea.vmem %s3669_s0, %s3766_s17  ;;  %3724 = vst [vmem:[#allocation21_spill] sm:$0xff] %v2900_v11  ;;  %v2903_v12 = vadd.s32 8, %v2900_v11  ;;  %v2907_v16 = vsub.s32 0, %v2900_v11  ;;  %v2910_v17 = vadd.s32 16, %v2900_v11  ;;  %v952_v23 = vcvt.s32.f32 %v2900_v11 }
  0x9d   : > { %v573_v1 = vld [vmem:[%s550_s29] sm:$0x1]  ;;  %v2895_v2 = vld [vmem:[%s550_s29 + $0x1] sm:$0x1]  ;;  %v2915_v24 = vadd.s32 24, %v2900_v11  ;;  %v2922_v28 = vadd.s32 32, %v2900_v11  ;;  %s3278_s27 = scalar_lea.vmem %s3671_s2, %s3766_s17  ;;  %s563_s15 = scalar_lea.vmem %s3675_s6, %s3766_s17 }
  0x9e   : > { %v571_v3 = vld [vmem:[%s2893_s3] sm:$0x1]  ;;  %v903_v4 = vcvt.s32.f32 %v2895_v2  ;;  %1013 = vperm.xlu0 %2306, %v573_v1   ;;  %v902_v5 = vcvt.s32.f32 %v573_v1  ;;  %v572_v15 = vld [vmem:[%s2893_s3 + $0x1] sm:$0x1]  ;;  %v953_v21 = vcvt.s32.f32 %v2903_v12  ;;  %v954_v27 = vcvt.s32.f32 %v2910_v17  ;;  %s2112_s29 = sshll.u32 %s2664_s13, 7  ;;  %p3755_p1 = scmp.ne.s32.totalorder %s3753_s16, 0 }
  0x9f   : > { %v898_v6 = vcvt.s32.f32 %v571_v3  ;;  %v899_v25 = vcvt.s32.f32 %v572_v15  ;;  %v955_v31 = vcvt.s32.f32 %v2915_v24  ;;  %v2932_v32 = vadd.s32 40, %v2900_v11  ;;  %s2592_s13 = smov [#allocation10]  }
  0xa0   : > { %v905_v7 = vmax.f32 %v903_v4, 1.0  ;;  %v904_v8 = vmax.f32 %v902_v5, 1.0  ;;  %v956_v35 = vcvt.s32.f32 %v2922_v28  ;;  %v2939_v36 = vadd.s32 48, %v2900_v11  ;;  %s2514_s30 = sshll.u32 %s2592_s13, 4  ;;  %s2515_s30 = int_to_ptr.vmem [resolvable:$false] %s2514_s30 }
  0xa1   : > { %v900_v9 = vmax.f32 %v898_v6, 1.0  ;;  %v901_v33 = vmax.f32 %v899_v25, 1.0  ;;  %v957_v38 = vcvt.s32.f32 %v2932_v32  ;;  %v2944_v39 = vadd.s32 56, %v2900_v11 }
  0xa2   : > { %2308 = vrcp.f32 %v905_v7  ;;  %v958_v41 = vcvt.s32.f32 %v2939_v36  ;;  %v2951_v42 = vadd.s32 64, %v2900_v11  ;;  %v2956_v45 = vadd.s32 80, %v2900_v11 }
  0xa3   : > { %2310 = vrcp.f32 %v904_v8  ;;  %v959_v44 = vcvt.s32.f32 %v2944_v39  ;;  %v2961_v48 = vadd.s32 72, %v2900_v11  ;;  %v2966_v51 = vadd.s32 96, %v2900_v11 }
  0xa4   : > { %2312 = vrcp.f32 %v900_v9  ;;  %v960_v47 = vcvt.s32.f32 %v2951_v42  ;;  %v962_v50 = vcvt.s32.f32 %v2956_v45  ;;  %v2971_v54 = vadd.s32 88, %v2900_v11 }
  0xa5   : > { %2314 = vrcp.f32 %v901_v33  ;;  %v961_v53 = vcvt.s32.f32 %v2961_v48  ;;  %v964_v56 = vcvt.s32.f32 %v2966_v51  ;;  %v2976_v57 = vadd.s32 120, %v2900_v11 }
  0xa6   : > { %v963_v60 = vcvt.s32.f32 %v2971_v54  ;;  %v2981_v61 = vadd.s32 104, %v2900_v11  ;;  %v2988_v4 = vadd.s32 112, %v2900_v11 }
  0xa7   : > { %3725 = vst [vmem:[#allocation22_spill] sm:$0xff] %v2976_v57  ;;  %v967_v63 = vcvt.s32.f32 %v2976_v57 }
  0xa8   : > { %3726 = vst [vmem:[#allocation23_spill] sm:$0xff] %v2981_v61  ;;  %v965_v3 = vcvt.s32.f32 %v2981_v61  ;;  %3727 = vst [vmem:[#allocation24_spill] sm:$0xff] %v2988_v4  ;;  %v966_v8 = vcvt.s32.f32 %v2988_v4 }
  0xaf   : > { %v2309_v13 = vpop.eup %2308 }
  0xb0   : > { %v2311_v14 = vpop.eup %2310  ;;  %v913_v22 = vmul.f32 1.767767, %v2309_v13 }
  0xb1   : > { %v2313_v18 = vpop.eup %2312  ;;  %v911_v19 = vmul.f32 1.767767, %v2311_v14 }
  0xb2   : > { %v907_v20 = vmul.f32 1.767767, %v2313_v18  ;;  %v2315_v58 = vpop.eup %2314 }
  0xb3   : > { %934 = vperm.xlu0 %2306, %v911_v19   ;;  %v909_v0 = vmul.f32 1.767767, %v2315_v58 }
  0xb4   : > { %v2918_v26 = vrot.slane %v907_v20, %v2907_v16 }
  0xb5   : > { %v977_v6 = vrot.slane %v909_v0, %v2907_v16 }
  0xb6   : > { %v981_v29 = vmul.f32 %v2918_v26, %v953_v21  ;;  %v980_v30 = vmul.f32 %v2918_v26, %v952_v23  ;;  %v982_v34 = vmul.f32 %v2918_v26, %v954_v27  ;;  %v983_v37 = vmul.f32 %v2918_v26, %v955_v31 }
  0xb7   : > { %943 = vperm.xlu0 %2306, %v913_v22   ;;  %v984_v40 = vmul.f32 %v2918_v26, %v956_v35  ;;  %v985_v43 = vmul.f32 %v2918_v26, %v957_v38  ;;  %v986_v46 = vmul.f32 %v2918_v26, %v958_v41  ;;  %v987_v49 = vmul.f32 %v2918_v26, %v959_v44 }
  0xb8   : > { %1071 = vperm.xlu1 %2307, %v981_v29   ;;  %v988_v52 = vmul.f32 %v2918_v26, %v960_v47  ;;  %v990_v55 = vmul.f32 %v2918_v26, %v962_v50  ;;  %v989_v59 = vmul.f32 %v2918_v26, %v961_v53  ;;  %v992_v62 = vmul.f32 %v2918_v26, %v964_v56 }
  0xb9   : > { %v991_v1 = vmul.f32 %v2918_v26, %v963_v60  ;;  %v995_v5 = vmul.f32 %v2918_v26, %v967_v63  ;;  %v993_v7 = vmul.f32 %v2918_v26, %v965_v3  ;;  %v997_v9 = vmul.f32 %v977_v6, %v953_v21 }
  0xba   : > { %v994_v13 = vmul.f32 %v2918_v26, %v966_v8  ;;  %v999_v14 = vmul.f32 %v977_v6, %v955_v31  ;;  %v996_v15 = vmul.f32 %v977_v6, %v952_v23  ;;  %v1001_v18 = vmul.f32 %v977_v6, %v957_v38  ;;  %v2214_v38 = vld [vmem:[%s2876_s24 + $0x8] sm:$0xff]  }
  0xbb   : > { %1066 = vperm.xlu0 %2306, %v980_v30   ;;  %v998_v19 = vmul.f32 %v977_v6, %v954_v27  ;;  %v1003_v20 = vmul.f32 %v977_v6, %v959_v44  ;;  %v1000_v21 = vmul.f32 %v977_v6, %v956_v35  ;;  %v1004_v22 = vmul.f32 %v977_v6, %v960_v47 }
  0xbc   : > { %1076 = vperm.xlu1 %2307, %v982_v34   ;;  %v1002_v25 = vmul.f32 %v977_v6, %v958_v41  ;;  %v1006_v26 = vmul.f32 %v977_v6, %v962_v50  ;;  %v1008_v23 = vmul.f32 %v977_v6, %v964_v56  ;;  %v1005_v27 = vmul.f32 %v977_v6, %v961_v53  ;;  %v2148_v34 = vld [vmem:[%s2876_s24] sm:$0xff]  }
  0xbd   : > { %v1010_v29 = vmul.f32 %v977_v6, %v966_v8  ;;  %v1007_v30 = vmul.f32 %v977_v6, %v963_v60  ;;  %v1009_v31 = vmul.f32 %v977_v6, %v965_v3  ;;  %v1011_v33 = vmul.f32 %v977_v6, %v967_v63 }
  0xbe   : > { %v3006_v35 = vand.u32 127, %v607_v10  ;;  %v2149_v41 = vunpack.c.l.bf16 %v2148_v34  ;;  %v3693_v44 = vmov 0.0   ;;  %v2154_v50 = vunpack.c.h.bf16 %v2214_v38 }
  0xbf   : > { %1081 = vperm.xlu0 %2306, %v983_v37  }
  0xc0   : > { %1086 = vperm.xlu1 %2307, %v984_v40   ;;  %v2150_v40 = vunpack.c.h.bf16 %v2148_v34 }
  0xc3   : > { %1091 = vperm.xlu0 %2306, %v985_v43   ;;  %v2153_v43 = vunpack.c.l.bf16 %v2214_v38 }
  0xc4   : > { %1096 = vperm.xlu1 %2307, %v986_v46  }
  0xc7   : > { %1101 = vperm.xlu0 %2306, %v987_v49  }
  0xc8   : > { %1106 = vperm.xlu1 %2307, %v988_v52   ;;  %v2215_v52 = vld [vmem:[%s2876_s24 + $0x10] sm:$0xff]  }
  0xc9   : > { %v2158_v58 = vunpack.c.h.bf16 %v2215_v52 }
  0xcb   : > { %1116 = vperm.xlu0 %2306, %v990_v55   ;;  %v2157_v55 = vunpack.c.l.bf16 %v2215_v52 }
  0xcc   : > { %1111 = vperm.xlu1 %2307, %v989_v59   ;;  %v2216_v59 = vld [vmem:[%s2876_s24 + $0x18] sm:$0xff]  }
  0xcd   : > { %v2161_v0 = vunpack.c.l.bf16 %v2216_v59 }
  0xcf   : > { %1126 = vperm.xlu0 %2306, %v992_v62   ;;  %v931_v62 = vcvt.s32.f32 %v3006_v35 }
  0xd0   : > { %1121 = vperm.xlu1 %2307, %v991_v1  }
  0xd3   : > { %1141 = vperm.xlu0 %2306, %v995_v5  }
  0xd4   : > { %1131 = vperm.xlu1 %2307, %v993_v7   ;;  %v2162_v7 = vunpack.c.h.bf16 %v2216_v59 }
  0xd7   : > { %1151 = vperm.xlu0 %2306, %v997_v9   ;;  %v2217_v9 = vld [vmem:[%s2876_s24 + $0x20] sm:$0xff]  }
  0xd8   : > { %1136 = vperm.xlu1 %2307, %v994_v13  }
  0xdb   : > { %1161 = vperm.xlu0 %2306, %v999_v14  }
  0xdc   : > { %1146 = vperm.xlu1 %2307, %v996_v15  }
  0xdf   : > { %1171 = vperm.xlu0 %2306, %v1001_v18  }
  0xe0   : > { %1156 = vperm.xlu1 %2307, %v998_v19   ;;  %v2165_v19 = vunpack.c.l.bf16 %v2217_v9 }
  0xe3   : > { %1181 = vperm.xlu0 %2306, %v1003_v20  }
  0xe4   : > { %1166 = vperm.xlu1 %2307, %v1000_v21  }
  0xe7   : > { %1186 = vperm.xlu0 %2306, %v1004_v22  }
  0xe8   : > { %1176 = vperm.xlu1 %2307, %v1002_v25  }
  0xeb   : > { %1196 = vperm.xlu0 %2306, %v1006_v26  }
  0xec   : > { %1020 = vperm.xlu1 %2307, %v2895_v2  }
  0xef   : > { %1206 = vperm.xlu0 %2306, %v1008_v23  }
  0xf0   : > { %1191 = vperm.xlu1 %2307, %v1005_v27  }
  0xf3   : > { %1216 = vperm.xlu0 %2306, %v1010_v29  }
  0xf4   : > { %1201 = vperm.xlu1 %2307, %v1007_v30   ;;  %v2166_v30 = vunpack.c.h.bf16 %v2217_v9 }
  0xf8   : > { %1211 = vperm.xlu1 %2307, %v1009_v31  }
  0xfc   : > { %1221 = vperm.xlu1 %2307, %v1011_v33  }
 0x119   : > { %v1014_v37 = vpop.permute.xlu0 %1013 }
 0x11a   : > { %v1018_v2 = vrot.slane %v1014_v37, %v2907_v16  ;;  %v2218_v37 = vld [vmem:[%s2876_s24 + $0x28] sm:$0xff]  }
 0x11c   : > { %vm1026_vm0 = vcmp.lt.s32.totalorder %v3006_v35, %v1018_v2 }
 0x11d   : > { %v3012_v46 = vsel %vm1026_vm0, 1.0, %v3693_v44 }
 0x11e   : > { %v3015_v47 = vmul.f32 %v2150_v40, %v3012_v46  ;;  %v3018_v10 = vmul.f32 %v2149_v41, %v3012_v46  ;;  %v3022_v49 = vmul.f32 %v2153_v43, %v3012_v46  ;;  %v3028_v53 = vmul.f32 %v2154_v50, %v3012_v46 }
 0x11f   : > { %v3032_v56 = vmul.f32 %v2157_v55, %v3012_v46  ;;  %v3037_v60 = vmul.f32 %v2158_v58, %v3012_v46  ;;  %v3049_v6 = vmul.f32 %v2161_v0, %v3012_v46  ;;  %v3055_v18 = vmul.f32 %v2162_v7, %v3012_v46 }
 0x120   : > { %1418 = vadd.xlane.f32.xlu1 %v3015_v47  ;;  %1416 = vadd.xlane.f32.xlu0 %v3018_v10  ;;  %v3061_v29 = vmul.f32 %v2165_v19, %v3012_v46  ;;  %v3068_v52 = vmul.f32 %v2166_v30, %v3012_v46  ;;  %v2169_v55 = vunpack.c.l.bf16 %v2218_v37 }
 0x122   : > { %v3073_v7 = vmul.f32 %v2169_v55, %v3012_v46 }
 0x124   : > { %1420 = vadd.xlane.f32.xlu1 %v3022_v49 }
 0x128   : > { %1422 = vadd.xlane.f32.xlu1 %v3028_v53 }
 0x12c   : > { %1424 = vadd.xlane.f32.xlu1 %v3032_v56 }
 0x12e   : > { %v935_v63 = vpop.permute.xlu0 %934 }
 0x12f   : > { %v940_v1 = vrot.slane %v935_v63, %v2907_v16 }
 0x130   : > { %1426 = vadd.xlane.f32.xlu1 %v3037_v60 }
 0x131   : > { %v3044_v3 = vmul.f32 %v940_v1, %v931_v62 }
 0x132   : > { %v3046_v5 = vpop.permute.xlu0 %943 }
 0x133   : > { %v1072_v8 = vpop.permute.xlu1 %1071 }
 0x134   : > { %v1225_v13 = vsub.f32 %v3044_v3, %v1072_v8  ;;  %1428 = vadd.xlane.f32.xlu1 %v3049_v6  ;;  %v2170_v8 = vunpack.c.h.bf16 %v2218_v37 }
 0x136   : > { %v1257_v14 = vmul.f32 %v1225_v13, %v1225_v13  ;;  %v1067_v15 = vpop.permute.xlu0 %1066  ;;  %v2219_v13 = vld [vmem:[%s2876_s24 + $0x30] sm:$0xff]  }
 0x137   : > { %v1077_v20 = vpop.permute.xlu1 %1076  ;;  %v1224_v21 = vsub.f32 %v3044_v3, %v1067_v15 }
 0x138   : > { %v1289_v22 = vsub.f32 0.0, %v1257_v14  ;;  %v1226_v25 = vsub.f32 %v3044_v3, %v1077_v20  ;;  %1430 = vadd.xlane.f32.xlu1 %v3055_v18 }
 0x139   : > { %v1256_v26 = vmul.f32 %v1224_v21, %v1224_v21 }
 0x13a   : > { %v1258_v23 = vmul.f32 %v1226_v25, %v1226_v25  ;;  %v1082_v27 = vpop.permute.xlu0 %1081  ;;  %v1322_v38 = vmul.f32 1.442695, %v1289_v22  ;;  %v3079_v22 = vmul.f32 %v2170_v8, %v3012_v46  ;;  %v2173_v25 = vunpack.c.l.bf16 %v2219_v13 }
 0x13b   : > { %v1288_v31 = vsub.f32 0.0, %v1256_v26  ;;  %v1087_v33 = vpop.permute.xlu1 %1086  ;;  %v1227_v34 = vsub.f32 %v3044_v3, %v1082_v27 }
 0x13c   : > { %1432 = vadd.xlane.f32.xlu1 %v3061_v29  ;;  %v1290_v2 = vsub.f32 0.0, %v1258_v23  ;;  %v1228_v41 = vsub.f32 %v3044_v3, %v1087_v33  ;;  %v3084_v33 = vmul.f32 %v2173_v25, %v3012_v46 }
 0x13d   : > { %v1320_v40 = vmul.f32 1.442695, %v1288_v31  ;;  %v1259_v43 = vmul.f32 %v1227_v34, %v1227_v34  ;;  %v2174_v34 = vunpack.c.h.bf16 %v2219_v13 }
 0x13e   : > { %v1092_v50 = vpop.permute.xlu0 %1091  ;;  %v1324_v59 = vmul.f32 1.442695, %v1290_v2  ;;  %v1260_v63 = vmul.f32 %v1228_v41, %v1228_v41 }
 0x13f   : > { %2316 = vpow2.f32 %v1320_v40  ;;  %v1097_v58 = vpop.permute.xlu1 %1096  ;;  %v1291_v0 = vsub.f32 0.0, %v1259_v43  ;;  %v1229_v1 = vsub.f32 %v3044_v3, %v1092_v50 }
 0x140   : > { %2318 = vpow2.f32 %v1322_v38  ;;  %1434 = vadd.xlane.f32.xlu1 %v3068_v52  ;;  %v1230_v14 = vsub.f32 %v3044_v3, %v1097_v58  ;;  %v1292_v15 = vsub.f32 0.0, %v1260_v63  ;;  %v2220_v38 = vld [vmem:[%s2876_s24 + $0x38] sm:$0xff]  }
 0x141   : > { %2320 = vpow2.f32 %v1324_v59  ;;  %v1326_v19 = vmul.f32 1.442695, %v1291_v0  ;;  %v1261_v20 = vmul.f32 %v1229_v1, %v1229_v1  ;;  %v3091_v59 = vmul.f32 %v2174_v34, %v3012_v46 }
 0x142   : > { %v1102_v21 = vpop.permute.xlu0 %1101  ;;  %v1262_v23 = vmul.f32 %v1230_v14, %v1230_v14  ;;  %v1328_v27 = vmul.f32 1.442695, %v1292_v15  ;;  %v2177_v63 = vunpack.c.l.bf16 %v2220_v38 }
 0x143   : > { %v1107_v9 = vpop.permute.xlu1 %1106  ;;  %2322 = vpow2.f32 %v1326_v19  ;;  %v1293_v30 = vsub.f32 0.0, %v1261_v20  ;;  %v1231_v31 = vsub.f32 %v3044_v3, %v1102_v21  ;;  %v2178_v20 = vunpack.c.h.bf16 %v2220_v38 }
 0x144   : > { %1436 = vadd.xlane.f32.xlu1 %v3073_v7  ;;  %v1294_v40 = vsub.f32 0.0, %v1262_v23  ;;  %v1232_v41 = vsub.f32 %v3044_v3, %v1107_v9  ;;  %2324 = vpow2.f32 %v1328_v27 }
 0x145   : > { %v1330_v50 = vmul.f32 1.442695, %v1293_v30  ;;  %v1263_v55 = vmul.f32 %v1231_v31, %v1231_v31 }
 0x146   : > { %v1332_v1 = vmul.f32 1.442695, %v1294_v40  ;;  %v1264_v8 = vmul.f32 %v1232_v41, %v1232_v41  ;;  %v1117_v14 = vpop.permute.xlu0 %1116 }
 0x147   : > { %v1112_v26 = vpop.permute.xlu1 %1111  ;;  %2326 = vpow2.f32 %v1330_v50  ;;  %v1295_v9 = vsub.f32 0.0, %v1263_v55  ;;  %v1234_v23 = vsub.f32 %v3044_v3, %v1117_v14 }
 0x148   : > { %1438 = vadd.xlane.f32.xlu1 %v3079_v22  ;;  %v1233_v13 = vsub.f32 %v3044_v3, %v1112_v26  ;;  %v1296_v25 = vsub.f32 0.0, %v1264_v8  ;;  %2328 = vpow2.f32 %v1332_v1 }
 0x149   : > { %v1334_v27 = vmul.f32 1.442695, %v1295_v9 }
 0x14a   : > { %v1265_v30 = vmul.f32 %v1233_v13, %v1233_v13  ;;  %v1336_v38 = vmul.f32 1.442695, %v1296_v25 }
 0x14b   : > { %v1122_v37 = vpop.permute.xlu1 %1121  ;;  %2330 = vpow2.f32 %v1334_v27 }
 0x14c   : > { %v2317_v2 = vpop.eup %2316  ;;  %1440 = vadd.xlane.f32.xlu1 %v3084_v33  ;;  %v1297_v40 = vsub.f32 0.0, %v1265_v30  ;;  %v1235_v41 = vsub.f32 %v3044_v3, %v1122_v37  ;;  %2332 = vpow2.f32 %v1336_v38  ;;  %v2221_v38 = vld [vmem:[%s2876_s24 + $0x40] sm:$0xff]  }
 0x14d   : > { %v2319_v43 = vpop.eup %2318  ;;  %v1384_v58 = vmul.f32 %v2317_v2, %v3018_v10  ;;  %v3097_v10 = vmul.f32 %v2177_v63, %v3012_v46  ;;  %v1266_v2 = vmul.f32 %v1234_v23, %v1234_v23 }
 0x14e   : > { %v1385_v15 = vmul.f32 %v2319_v43, %v3015_v47  ;;  %v2321_v19 = vpop.eup %2320  ;;  %v3103_v47 = vmul.f32 %v2178_v20, %v3012_v46  ;;  %v1127_v43 = vpop.permute.xlu0 %1126  ;;  %v1338_v63 = vmul.f32 1.442695, %v1297_v40  ;;  %v1267_v1 = vmul.f32 %v1235_v41, %v1235_v41 }
 0x14f   : > { %v1132_v0 = vpop.permute.xlu1 %1131  ;;  %1480 = vadd.xlane.f32.xlu0 %v1384_v58  ;;  %v1386_v26 = vmul.f32 %v2321_v19, %v3022_v49  ;;  %v1298_v46 = vsub.f32 0.0, %v1266_v2  ;;  %v1236_v58 = vsub.f32 %v3044_v3, %v1127_v43 }
 0x150   : > { %1442 = vadd.xlane.f32.xlu1 %v3091_v59  ;;  %v2323_v31 = vpop.eup %2322  ;;  %2334 = vpow2.f32 %v1338_v63 }
 0x151   : > { %v1387_v50 = vmul.f32 %v2323_v31, %v3028_v53  ;;  %v2325_v55 = vpop.eup %2324  ;;  %v1340_v37 = vmul.f32 1.442695, %v1298_v46  ;;  %v1268_v14 = vmul.f32 %v1236_v58, %v1236_v58  ;;  %v1299_v53 = vsub.f32 0.0, %v1267_v1 }
 0x152   : > { %v1388_v8 = vmul.f32 %v2325_v55, %v3032_v56  ;;  %v1142_v30 = vpop.permute.xlu0 %1141 }
 0x153   : > { %v1137_v21 = vpop.permute.xlu1 %1136  ;;  %1482 = vadd.xlane.f32.xlu0 %v1385_v15  ;;  %v1237_v15 = vsub.f32 %v3044_v3, %v1132_v0  ;;  %2336 = vpow2.f32 %v1340_v37  ;;  %v1300_v23 = vsub.f32 0.0, %v1268_v14  ;;  %v1342_v56 = vmul.f32 1.442695, %v1299_v53  ;;  %v2222_v14 = vld [vmem:[%s2876_s24 + $0x48] sm:$0xff]  }
 0x154   : > { %1444 = vadd.xlane.f32.xlu1 %v3097_v10  ;;  %v2327_v9 = vpop.eup %2326  ;;  %v949_v0 = vrot.slane %v3046_v5, %v2907_v16  ;;  %v1239_v41 = vsub.f32 %v3044_v3, %v1142_v30 }
 0x155   : > { %v1389_v19 = vmul.f32 %v2327_v9, %v3037_v60  ;;  %v2329_v20 = vpop.eup %2328  ;;  %v1269_v27 = vmul.f32 %v1237_v15, %v1237_v15  ;;  %v1344_v60 = vmul.f32 1.442695, %v1300_v23  ;;  %2338 = vpow2.f32 %v1342_v56 }
 0x156   : > { %v1390_v31 = vmul.f32 %v2329_v20, %v3049_v6  ;;  %v3131_v5 = vmul.f32 %v949_v0, %v931_v62  ;;  %v1271_v63 = vmul.f32 %v1239_v41, %v1239_v41  ;;  %v1152_v15 = vpop.permute.xlu0 %1151  ;;  %v2185_v56 = vunpack.c.l.bf16 %v2222_v14 }
 0x157   : > { %v3105_v34 = vpop.permute.xlu1 %1146  ;;  %1484 = vadd.xlane.f32.xlu0 %v1386_v26  ;;  %v1238_v26 = vsub.f32 %v3044_v3, %v1137_v21  ;;  %v1301_v55 = vsub.f32 0.0, %v1269_v27  ;;  %2340 = vpow2.f32 %v1344_v60  ;;  %v2186_v0 = vunpack.c.h.bf16 %v2222_v14 }
 0x158   : > { %1446 = vadd.xlane.f32.xlu1 %v3103_v47  ;;  %v2331_v2 = vpop.eup %2330  ;;  %v1240_v37 = vsub.f32 %v3131_v5, %v3105_v34  ;;  %v1303_v20 = vsub.f32 0.0, %v1271_v63 }
 0x159   : > { %v1270_v46 = vmul.f32 %v1238_v26, %v1238_v26  ;;  %v1391_v21 = vmul.f32 %v2331_v2, %v3055_v18  ;;  %v2333_v6 = vpop.eup %2332  ;;  %v1346_v18 = vmul.f32 1.442695, %v1301_v55  ;;  %v1241_v26 = vsub.f32 %v3131_v5, %v1152_v15 }
 0x15a   : > { %v1392_v62 = vmul.f32 %v2333_v6, %v3061_v29  ;;  %v1272_v34 = vmul.f32 %v1240_v37, %v1240_v37  ;;  %v1162_v60 = vpop.permute.xlu0 %1161 }
 0x15b   : > { %v3110_v49 = vpop.permute.xlu1 %1156  ;;  %1486 = vadd.xlane.f32.xlu0 %v1387_v50  ;;  %v2181_v50 = vunpack.c.l.bf16 %v2221_v38  ;;  %v1302_v9 = vsub.f32 0.0, %v1270_v46  ;;  %2342 = vpow2.f32 %v1346_v18  ;;  %v1273_v55 = vmul.f32 %v1241_v26, %v1241_v26 }
 0x15c   : > { %v1242_v41 = vsub.f32 %v3131_v5, %v3110_v49 }
 0x15d   : > { %v2335_v53 = vpop.eup %2334  ;;  %v1348_v30 = vmul.f32 1.442695, %v1302_v9 }
 0x15e   : > { %v1393_v29 = vmul.f32 %v2335_v53, %v3068_v52 }
 0x15f   : > { %v3114_v13 = vpop.permute.xlu1 %1166  ;;  %1488 = vadd.xlane.f32.xlu0 %v1388_v8  ;;  %v2182_v8 = vunpack.c.h.bf16 %v2221_v38  ;;  %v1350_v38 = vmul.f32 1.442695, %v1303_v20  ;;  %2344 = vpow2.f32 %v1348_v30  ;;  %v1172_v30 = vpop.permute.xlu0 %1171 }
 0x160   : > { %v2337_v27 = vpop.eup %2336 }
 0x161   : > { %v1394_v52 = vmul.f32 %v2337_v27, %v3073_v7  ;;  %2346 = vpow2.f32 %v1350_v38  ;;  %v1274_v7 = vmul.f32 %v1242_v41, %v1242_v41 }
 0x163   : > { %v3118_v25 = vpop.permute.xlu1 %1176  ;;  %1490 = vadd.xlane.f32.xlu0 %v1389_v19  ;;  %v1306_v27 = vsub.f32 0.0, %v1274_v7  ;;  %v3193_v7 = vld [vmem:[%s2876_s24 + $0x78] sm:$0xff]  }
 0x167   : > { %v1021_v40 = vpop.permute.xlu1 %1020  ;;  %1492 = vadd.xlane.f32.xlu0 %v1390_v31 }
 0x168   : > { %v1025_v43 = vrot.slane %v1021_v40, %v2907_v16  ;;  %v1304_v40 = vsub.f32 0.0, %v1272_v34  ;;  %v1244_v34 = vsub.f32 %v3131_v5, %v3114_v13 }
 0x16a   : > { %vm1027_vm1 = vcmp.lt.s32.totalorder %v3006_v35, %v1025_v43  ;;  %v2223_v43 = vld [vmem:[%s2876_s24 + $0x50] sm:$0xff]   ;;  %v1352_v49 = vmul.f32 1.442695, %v1304_v40 }
 0x16b   : > { %v3134_v58 = vsel %vm1027_vm1, 1.0, %v3693_v44  ;;  %v3136_v3 = vpop.permute.xlu1 %1191  ;;  %1494 = vadd.xlane.f32.xlu0 %v1391_v21  ;;  %v1243_v21 = vsub.f32 %v3131_v5, %v1162_v60  ;;  %v2190_v20 = vunpack.c.h.bf16 %v2223_v43  ;;  %v1245_v60 = vsub.f32 %v3131_v5, %v1172_v30 }
 0x16c   : > { %v3139_v1 = vmul.f32 %v2181_v50, %v3134_v58  ;;  %v3149_v23 = vmul.f32 %v2182_v8, %v3134_v58  ;;  %v3157_v2 = vmul.f32 %v2185_v56, %v3134_v58  ;;  %v2339_v50 = vpop.eup %2338  ;;  %v3167_v63 = vmul.f32 %v2186_v0, %v3134_v58  ;;  %v2224_v56 = vld [vmem:[%s2876_s24 + $0x58] sm:$0xff]  }
 0x16d   : > { %v2189_v8 = vunpack.c.l.bf16 %v2223_v43  ;;  %v2341_v18 = vpop.eup %2340  ;;  %v1395_v9 = vmul.f32 %v2339_v50, %v3079_v22  ;;  %v1275_v14 = vmul.f32 %v1243_v21, %v1243_v21  ;;  %2348 = vpow2.f32 %v1352_v49 }
 0x16e   : > { %1448 = vadd.xlane.f32.xlu1 %v3139_v1  ;;  %v1396_v22 = vmul.f32 %v2341_v18, %v3084_v33  ;;  %v2193_v0 = vunpack.c.l.bf16 %v2224_v56  ;;  %v3181_v41 = vmul.f32 %v2190_v20, %v3134_v58  ;;  %v1276_v43 = vmul.f32 %v1244_v34, %v1244_v34 }
 0x16f   : > { %v3146_v19 = vpop.permute.xlu1 %1201  ;;  %1496 = vadd.xlane.f32.xlu0 %v1392_v62  ;;  %v1305_v62 = vsub.f32 0.0, %v1273_v55  ;;  %v3172_v15 = vmul.f32 %v2189_v8, %v3134_v58  ;;  %v1307_v40 = vsub.f32 0.0, %v1275_v14  ;;  %v1277_v55 = vmul.f32 %v1245_v60, %v1245_v60  ;;  %v2225_v8 = vld [vmem:[%s2876_s24 + $0x60] sm:$0xff]  }
 0x170   : > { %v3186_v21 = vmul.f32 %v2193_v0, %v3134_v58  ;;  %v1308_v18 = vsub.f32 0.0, %v1276_v43  ;;  %v1246_v49 = vsub.f32 %v3131_v5, %v3118_v25  ;;  %v2210_v20 = vunpack.c.h.bf16 %v3193_v7 }
 0x171   : > { %v1354_v38 = vmul.f32 1.442695, %v1305_v62  ;;  %v1358_v50 = vmul.f32 1.442695, %v1307_v40  ;;  %v1309_v62 = vsub.f32 0.0, %v1277_v55  ;;  %v2198_v34 = vunpack.c.h.bf16 %v2225_v8 }
 0x172   : > { %1450 = vadd.xlane.f32.xlu1 %v3149_v23  ;;  %v1278_v25 = vmul.f32 %v1246_v49, %v1246_v49 }
 0x173   : > { %v3154_v31 = vpop.permute.xlu1 %1211  ;;  %1498 = vadd.xlane.f32.xlu0 %v1393_v29  ;;  %v2343_v29 = vpop.eup %2342 }
 0x174   : > { %v1397_v33 = vmul.f32 %v2343_v29, %v3091_v59  ;;  %v2345_v13 = vpop.eup %2344  ;;  %v1310_v40 = vsub.f32 0.0, %v1278_v25  ;;  %v2227_v25 = vld [vmem:[%s2876_s24 + $0x70] sm:$0xff]  }
 0x175   : > { %v1398_v59 = vmul.f32 %v2345_v13, %v3097_v10 }
 0x176   : > { %1452 = vadd.xlane.f32.xlu1 %v3157_v2 }
 0x177   : > { %v1222_v46 = vpop.permute.xlu1 %1221  ;;  %1500 = vadd.xlane.f32.xlu0 %v1394_v52  ;;  %v1356_v52 = vmul.f32 1.442695, %v1306_v27 }
 0x178   : > { %v1255_v6 = vsub.f32 %v3131_v5, %v1222_v46  ;;  %v1182_v46 = vpop.permute.xlu0 %1181 }
 0x179   : > { %v1247_v14 = vsub.f32 %v3131_v5, %v1182_v46  ;;  %v1364_v46 = vmul.f32 1.442695, %v1310_v40 }
 0x17a   : > { %v1287_v37 = vmul.f32 %v1255_v6, %v1255_v6  ;;  %1454 = vadd.xlane.f32.xlu1 %v3167_v63  ;;  %v2194_v6 = vunpack.c.h.bf16 %v2224_v56  ;;  %v1360_v56 = vmul.f32 1.442695, %v1308_v18 }
 0x17b   : > { %1502 = vadd.xlane.f32.xlu0 %v1395_v9  ;;  %v2347_v9 = vpop.eup %2346  ;;  %v1279_v29 = vmul.f32 %v1247_v14, %v1247_v14 }
 0x17c   : > { %v1319_v53 = vsub.f32 0.0, %v1287_v37  ;;  %v2197_v37 = vunpack.c.l.bf16 %v2225_v8  ;;  %v1399_v10 = vmul.f32 %v2347_v9, %v3103_v47  ;;  %v2349_v27 = vpop.eup %2348  ;;  %v1187_v30 = vpop.permute.xlu0 %1186 }
 0x17d   : > { %v1248_v60 = vsub.f32 %v3131_v5, %v1187_v30  ;;  %v1400_v47 = vmul.f32 %v2349_v27, %v3139_v1  ;;  %v1311_v13 = vsub.f32 0.0, %v1279_v29  ;;  %v1249_v1 = vsub.f32 %v3131_v5, %v3136_v3 }
 0x17e   : > { %v1382_v26 = vmul.f32 1.442695, %v1319_v53  ;;  %1456 = vadd.xlane.f32.xlu1 %v3172_v15  ;;  %v3198_v53 = vmul.f32 %v2194_v6, %v3134_v58  ;;  %v2205_v27 = vunpack.c.l.bf16 %v2227_v25  ;;  %v1251_v29 = vsub.f32 %v3131_v5, %v3146_v19 }
 0x17f   : > { %1504 = vadd.xlane.f32.xlu0 %v1396_v22  ;;  %v1362_v22 = vmul.f32 1.442695, %v1309_v62  ;;  %v1280_v6 = vmul.f32 %v1248_v60, %v1248_v60 }
 0x180   : > { %2350 = vpow2.f32 %v1382_v26  ;;  %v3204_v26 = vmul.f32 %v2197_v37, %v3134_v58  ;;  %v1197_v8 = vpop.permute.xlu0 %1196 }
 0x181   : > { %2352 = vpow2.f32 %v1354_v38  ;;  %v3207_v38 = vmul.f32 %v2210_v20, %v3134_v58  ;;  %v1250_v9 = vsub.f32 %v3131_v5, %v1197_v8  ;;  %v1312_v14 = vsub.f32 0.0, %v1280_v6 }
 0x182   : > { %1458 = vadd.xlane.f32.xlu1 %v3181_v41  ;;  %2354 = vpow2.f32 %v1356_v52  ;;  %v2226_v52 = vld [vmem:[%s2876_s24 + $0x68] sm:$0xff]   ;;  %v1281_v20 = vmul.f32 %v1249_v1, %v1249_v1  ;;  %v2209_v8 = vunpack.c.l.bf16 %v3193_v7  ;;  %s2067_s24 = sshll.u32 %s2856_s11, 3 }
 0x183   : > { %1506 = vadd.xlane.f32.xlu0 %v1397_v33  ;;  %2356 = vpow2.f32 %v1358_v50  ;;  %v3217_v50 = vmul.f32 %v2198_v34, %v3134_v58  ;;  %v2201_v55 = vunpack.c.l.bf16 %v2226_v52  ;;  %v2202_v62 = vunpack.c.h.bf16 %v2226_v52  ;;  %s541_s9 = scalar_lea.vmem [#allocation10], %s2067_s24 }
 0x184   : > { %2358 = vpow2.f32 %v1360_v56  ;;  %v1368_v30 = vmul.f32 1.442695, %v1312_v14  ;;  %v1313_v34 = vsub.f32 0.0, %v1281_v20  ;;  %v2206_v52 = vunpack.c.h.bf16 %v2227_v25  ;;  %s1862_s22 = sshll.u32 %s541_s9, 4  ;;  %s1863_s22 = int_to_ptr.vmem [resolvable:$true] %s1862_s22 }
 0x185   : > { %2360 = vpow2.f32 %v1362_v22  ;;  %v3225_v37 = vmul.f32 %v2201_v55, %v3134_v58  ;;  %v1207_v22 = vpop.permute.xlu0 %1206  ;;  %v1283_v55 = vmul.f32 %v1251_v29, %v1251_v29  ;;  %p2517_p6 = scmp.lt.s32.totalorder %s1863_s22, %s2515_s30 }
 0x186   : > { %1460 = vadd.xlane.f32.xlu1 %v3186_v21  ;;  %2362 = vpow2.f32 %v1364_v46  ;;  %v1252_v60 = vsub.f32 %v3131_v5, %v1207_v22  ;;  %v1061_v6 = vmul.f32 %v2206_v52, %v3134_v58 }
 0x187   : > { %1508 = vadd.xlane.f32.xlu0 %v1398_v59  ;;  %v1366_v59 = vmul.f32 1.442695, %v1311_v13  ;;  %v1370_v13 = vmul.f32 1.442695, %v1313_v34  ;;  %v1315_v1 = vsub.f32 0.0, %v1283_v55 }
 0x189   : > { %2364 = vpow2.f32 %v1366_v59  ;;  %v1374_v20 = vmul.f32 1.442695, %v1315_v1 }
 0x18a   : > { %1462 = vadd.xlane.f32.xlu1 %v3198_v53  ;;  %2366 = vpow2.f32 %v1368_v30 }
 0x18b   : > { %1510 = vadd.xlane.f32.xlu0 %v1399_v10  ;;  %v3231_v10 = vmul.f32 %v2202_v62, %v3134_v58  ;;  %2368 = vpow2.f32 %v1370_v13  ;;  %v1062_v62 = vmul.f32 %v2209_v8, %v3134_v58 }
 0x18d   : > { %v2351_v0 = vpop.eup %2350 }
 0x18e   : > { %1464 = vadd.xlane.f32.xlu1 %v3204_v26  ;;  %v3214_v43 = vmul.f32 %v2351_v0, %v3207_v38  ;;  %v2353_v33 = vpop.eup %2352 }
 0x18f   : > { %1512 = vadd.xlane.f32.xlu0 %v1400_v47  ;;  %v1401_v18 = vmul.f32 %v2353_v33, %v3149_v23  ;;  %v2355_v49 = vpop.eup %2354  ;;  %v1282_v23 = vmul.f32 %v1250_v9, %v1250_v9  ;;  %v3239_v47 = vmul.f32 %v2205_v27, %v3134_v58  ;;  %v1217_v9 = vpop.permute.xlu0 %1216 }
 0x190   : > { %v1402_v56 = vmul.f32 %v2355_v49, %v3157_v2  ;;  %v2357_v3 = vpop.eup %2356 }
 0x191   : > { %v1403_v0 = vmul.f32 %v2357_v3, %v3167_v63  ;;  %v2359_v2 = vpop.eup %2358  ;;  %v1314_v40 = vsub.f32 0.0, %v1282_v23  ;;  %v1284_v63 = vmul.f32 %v1252_v60, %v1252_v60 }
 0x192   : > { %1466 = vadd.xlane.f32.xlu1 %v3217_v50  ;;  %v2361_v33 = vpop.eup %2360  ;;  %v1404_v46 = vmul.f32 %v2359_v2, %v3172_v15 }
 0x193   : > { %1514 = vadd.xlane.f32.xlu0 %v1401_v18  ;;  %v1372_v19 = vmul.f32 1.442695, %v1314_v40  ;;  %v1253_v18 = vsub.f32 %v3131_v5, %v3154_v31  ;;  %v1405_v49 = vmul.f32 %v2361_v33, %v3181_v41  ;;  %v2363_v59 = vpop.eup %2362  ;;  %v1316_v15 = vsub.f32 0.0, %v1284_v63  ;;  %v2396_v33 = vld [vmem:[%s2893_s3] sm:$0x1] }
 0x194   : > { %v1406_v25 = vmul.f32 %v2363_v59, %v3186_v21 }
 0x195   : > { %2370 = vpow2.f32 %v1372_v19  ;;  %v1285_v7 = vmul.f32 %v1253_v18, %v1253_v18  ;;  %v1376_v31 = vmul.f32 1.442695, %v1316_v15 }
 0x196   : > { %1468 = vadd.xlane.f32.xlu1 %v3225_v37  ;;  %v2365_v14 = vpop.eup %2364  ;;  %2372 = vpow2.f32 %v1374_v20 }
 0x197   : > { %1516 = vadd.xlane.f32.xlu0 %v1402_v56  ;;  %v1254_v56 = vsub.f32 %v3131_v5, %v1217_v9  ;;  %v1317_v3 = vsub.f32 0.0, %v1285_v7  ;;  %v1407_v27 = vmul.f32 %v2365_v14, %v3198_v53  ;;  %v2367_v30 = vpop.eup %2366  ;;  %2374 = vpow2.f32 %v1376_v31 }
 0x198   : > { %v1408_v21 = vmul.f32 %v2367_v30, %v3204_v26  ;;  %v2369_v22 = vpop.eup %2368 }
 0x199   : > { %v1286_v41 = vmul.f32 %v1254_v56, %v1254_v56  ;;  %v1378_v34 = vmul.f32 1.442695, %v1317_v3  ;;  %v1409_v40 = vmul.f32 %v2369_v22, %v3217_v50 }
 0x19a   : > { %1470 = vadd.xlane.f32.xlu1 %v3231_v10 }
 0x19b   : > { %1518 = vadd.xlane.f32.xlu0 %v1403_v0  ;;  %v1318_v58 = vsub.f32 0.0, %v1286_v41  ;;  %2376 = vpow2.f32 %v1378_v34 }
 0x19d   : > { %v1380_v0 = vmul.f32 1.442695, %v1318_v58  ;;  %v3308_v58 = vld [vmem:[%s2893_s3 + $0x1] sm:$0x1] }
 0x19e   : > { %1472 = vadd.xlane.f32.xlu1 %v3239_v47 }
 0x19f   : > { %1520 = vadd.xlane.f32.xlu0 %v1404_v46  ;;  %2378 = vpow2.f32 %v1380_v0 }
 0x1a2   : > { %1474 = vadd.xlane.f32.xlu1 %v1061_v6  ;;  %v2371_v29 = vpop.eup %2370 }
 0x1a3   : > { %1522 = vadd.xlane.f32.xlu0 %v1405_v49  ;;  %v1410_v60 = vmul.f32 %v2371_v29, %v3225_v37  ;;  %v2373_v52 = vpop.eup %2372 }
 0x1a4   : > { %v1411_v13 = vmul.f32 %v2373_v52, %v3231_v10  ;;  %v2375_v55 = vpop.eup %2374  ;;  %v575_v10 = vld [vmem:[%s3278_s27] sm:$0x1] }
 0x1a5   : > { %v1412_v50 = vmul.f32 %v2375_v55, %v3239_v47  ;;  %vm577_vm2 = vcmp.eq.s32.totalorder %v575_v10, 0  ;;  %v3284_v47 = vrot.slane %v2396_v33, %v2907_v16 }
 0x1a6   : > { %1476 = vadd.xlane.f32.xlu1 %v1062_v62 }
 0x1a7   : > { %1524 = vadd.xlane.f32.xlu0 %v1406_v25  ;;  %vm1552_vm3 = vcmp.lt.s32.totalorder %v2900_v11, %v3284_v47  ;;  %vm1553_vm4 = vcmp.lt.s32.totalorder %v2903_v12, %v3284_v47  ;;  %vm1554_vm5 = vcmp.lt.s32.totalorder %v2910_v17, %v3284_v47  ;;  %vm1555_vm6 = vcmp.lt.s32.totalorder %v2915_v24, %v3284_v47 }
 0x1a8   : > { %v2377_v19 = vpop.eup %2376  ;;  %v2080_v20 = vsel %vm1553_vm4, 1.0, %v3693_v44  ;;  %v2081_v3 = vsel %vm1554_vm5, 1.0, %v3693_v44  ;;  %v2082_v22 = vsel %vm1555_vm6, 1.0, %v3693_v44  ;;  %vm1556_vm8 = vcmp.lt.s32.totalorder %v2922_v28, %v3284_v47 }
 0x1a9   : > { %v3251_v23 = vpop.xlane.xlu1 %1418  ;;  %v1413_v63 = vmul.f32 %v2377_v19, %v1061_v6  ;;  %v2073_v6 = vsel %vm577_vm2, 1.0, %v3693_v44  ;;  %v1417_v59 = vpop.xlane.xlu0 %1416  ;;  %v2083_v55 = vsel %vm1556_vm8, 1.0, %v3693_v44  ;;  %vm1557_vm9 = vcmp.lt.s32.totalorder %v2932_v32, %v3284_v47 }
 0x1aa   : > { %v3292_v15 = vrot.slane %v2073_v6, %v2907_v16  ;;  %v2084_v6 = vsel %vm1557_vm9, 1.0, %v3693_v44  ;;  %vm1558_vm10 = vcmp.lt.s32.totalorder %v2939_v36, %v3284_v47  ;;  %vm1559_vm11 = vcmp.lt.s32.totalorder %v2944_v39, %v3284_v47 }
 0x1ab   : > { %1526 = vadd.xlane.f32.xlu0 %v1407_v27  ;;  %vm1560_vm12 = vcmp.lt.s32.totalorder %v2951_v42, %v3284_v47  ;;  %vm1561_vm13 = vcmp.lt.s32.totalorder %v2961_v48, %v3284_v47  ;;  %vm1562_vm14 = vcmp.lt.s32.totalorder %v2956_v45, %v3284_v47  ;;  %vm1563_vm15 = vcmp.lt.s32.totalorder %v2971_v54, %v3284_v47 }
 0x1ac   : > { %v2379_v8 = vpop.eup %2378  ;;  %v1661_v31 = vmul.f32 %v2080_v20, %v3292_v15  ;;  %v1665_v20 = vmul.f32 %v2084_v6, %v3292_v15  ;;  %vm1564_vm0 = vcmp.lt.s32.totalorder %v2966_v51, %v3284_v47  ;;  %vm1565_vm1 = vcmp.lt.s32.totalorder %v2981_v61, %v3284_v47 }
 0x1ad   : > { %v3254_v5 = vpop.xlane.xlu1 %1420  ;;  %v1414_v1 = vmul.f32 %v2379_v8, %v1062_v62  ;;  %v2079_v62 = vsel %vm1552_vm3, 1.0, %v3693_v44  ;;  %vm1566_vm2 = vcmp.lt.s32.totalorder %v2988_v4, %v3284_v47  ;;  %vm1567_vm3 = vcmp.lt.s32.totalorder %v2976_v57, %v3284_v47 }
 0x1ae   : > { %v1660_v56 = vmul.f32 %v2079_v62, %v3292_v15  ;;  %v3739_v61 = vmov 0.0  }
 0x1af   : > { %1528 = vadd.xlane.f32.xlu0 %v1408_v21  ;;  %v1662_v21 = vmul.f32 %v2081_v3, %v3292_v15 }
 0x1b1   : > { %v3257_v2 = vpop.xlane.xlu1 %1422 }
 0x1b3   : > { %1530 = vadd.xlane.f32.xlu0 %v1409_v40 }
 0x1b5   : > { %v3260_v53 = vpop.xlane.xlu1 %1424 }
 0x1b7   : > { %610 = vperm.xlu1 %2307, %v2396_v33   ;;  %1532 = vadd.xlane.f32.xlu0 %v1410_v60  ;;  %v1663_v33 = vmul.f32 %v2082_v22, %v3292_v15 }
 0x1b9   : > { %v3264_v26 = vpop.xlane.xlu1 %1426 }
 0x1bb   : > { %1534 = vadd.xlane.f32.xlu0 %v1411_v13 }
 0x1bd   : > { %v3267_v46 = vpop.xlane.xlu1 %1428 }
 0x1bf   : > { %1536 = vadd.xlane.f32.xlu0 %v1412_v50 }
 0x1c1   : > { %v3270_v37 = vpop.xlane.xlu1 %1430 }
 0x1c3   : > { %1538 = vadd.xlane.f32.xlu0 %v1413_v63 }
 0x1c5   : > { %v3272_v18 = vpop.xlane.xlu1 %1432 }
 0x1c7   : > { %1540 = vadd.xlane.f32.xlu0 %v1414_v1  ;;  %v1664_v1 = vmul.f32 %v2083_v55, %v3292_v15 }
 0x1c9   : > { %v3281_v49 = vpop.xlane.xlu1 %1434 }
 0x1cd   : > { %v3289_v9 = vpop.xlane.xlu1 %1436 }
 0x1d1   : > { %v3301_v25 = vpop.xlane.xlu1 %1438 }
 0x1d5   : > { %v3315_v29 = vpop.xlane.xlu1 %1440 }
 0x1d8   : > { %v1481_v14 = vpop.xlane.xlu0 %1480 }
 0x1d9   : > { %v1692_v7 = vsub.f32 %v1417_v59, %v1481_v14  ;;  %v3328_v8 = vpop.xlane.xlu1 %1442 }
 0x1db   : > { %1478 = vadd.xlane.f32.xlu1 %v3207_v38  ;;  %v1724_v27 = vmul.f32 %v1692_v7, %v1660_v56  ;;  %v2085_v7 = vsel %vm1558_vm10, 1.0, %v3693_v44 }
 0x1dc   : > { %v1483_v41 = vpop.xlane.xlu0 %1482 }
 0x1dd   : > { %v1693_v30 = vsub.f32 %v3251_v23, %v1483_v41  ;;  %617 = vperm.xlu0 %2306, %v3308_v58   ;;  %v1757_v0 = vsel %vm1756_vm7, %v1724_v27, 0.0 }
 0x1df   : > { %v1725_v34 = vmul.f32 %v1693_v30, %v1661_v31  ;;  %v3338_v31 = vpop.xlane.xlu1 %1444  ;;  %v1666_v30 = vmul.f32 %v2085_v7, %v3292_v15 }
 0x1e0   : > { %v1485_v38 = vpop.xlane.xlu0 %1484 }
 0x1e1   : > { %v1758_v23 = vsel %vm1756_vm7, %v1725_v34, 0.0  ;;  %v1694_v40 = vsub.f32 %v3254_v5, %v1485_v38 }
 0x1e2   : > { %v1759_v60 = vadd.f32 %v1758_v23, %v1757_v0 }
 0x1e3   : > { %v1726_v52 = vmul.f32 %v1694_v40, %v1662_v21  ;;  %v2086_v21 = vsel %vm1559_vm11, 1.0, %v3693_v44  ;;  %v3350_v23 = vpop.xlane.xlu1 %1446 }
 0x1e4   : > { %v1487_v13 = vpop.xlane.xlu0 %1486  ;;  %v1667_v40 = vmul.f32 %v2086_v21, %v3292_v15 }
 0x1e5   : > { %v1760_v50 = vsel %vm1756_vm7, %v1726_v52, 0.0  ;;  %v1695_v19 = vsub.f32 %v3257_v2, %v1487_v13  ;;  %v2087_v52 = vsel %vm1560_vm12, 1.0, %v3693_v44 }
 0x1e6   : > { %v1761_v63 = vadd.f32 %v1760_v50, %v1759_v60 }
 0x1e7   : > { %v1727_v5 = vmul.f32 %v1695_v19, %v1663_v33  ;;  %v1668_v19 = vmul.f32 %v2087_v52, %v3292_v15 }
 0x1e8   : > { %v1489_v10 = vpop.xlane.xlu0 %1488 }
 0x1e9   : > { %v1762_v59 = vsel %vm1756_vm7, %v1727_v5, 0.0  ;;  %v1696_v62 = vsub.f32 %v3260_v53, %v1489_v10  ;;  %v2088_v5 = vsel %vm1561_vm13, 1.0, %v3693_v44 }
 0x1ea   : > { %v1763_v2 = vadd.f32 %v1762_v59, %v1761_v63 }
 0x1eb   : > { %v1728_v14 = vmul.f32 %v1696_v62, %v1664_v1  ;;  %v1669_v62 = vmul.f32 %v2088_v5, %v3292_v15 }
 0x1ec   : > { %v1491_v56 = vpop.xlane.xlu0 %1490 }
 0x1ed   : > { %v1764_v41 = vsel %vm1756_vm7, %v1728_v14, 0.0  ;;  %v1697_v3 = vsub.f32 %v3264_v26, %v1491_v56  ;;  %v2089_v14 = vsel %vm1562_vm14, 1.0, %v3693_v44  ;;  %vm711_vm14 = vcmask 1040384  }
 0x1ee   : > { %v1765_v53 = vadd.f32 %v1764_v41, %v1763_v2  ;;  %v1670_v41 = vmul.f32 %v2089_v14, %v3292_v15 }
 0x1ef   : > { %v1729_v27 = vmul.f32 %v1697_v3, %v1665_v20 }
 0x1f0   : > { %v1493_v34 = vpop.xlane.xlu0 %1492 }
 0x1f1   : > { %v1766_v38 = vsel %vm1756_vm7, %v1729_v27, 0.0  ;;  %v1698_v22 = vsub.f32 %v3267_v46, %v1493_v34  ;;  %v2090_v27 = vsel %vm1563_vm15, 1.0, %v3693_v44 }
 0x1f2   : > { %v1767_v0 = vadd.f32 %v1766_v38, %v1765_v53  ;;  %v1671_v21 = vmul.f32 %v2090_v27, %v3292_v15 }
 0x1f3   : > { %v1730_v26 = vmul.f32 %v1698_v22, %v1666_v30  ;;  %v2091_v22 = vsel %vm1564_vm0, 1.0, %v3693_v44 }
 0x1f4   : > { %v1495_v60 = vpop.xlane.xlu0 %1494  ;;  %v1672_v52 = vmul.f32 %v2091_v22, %v3292_v15 }
 0x1f5   : > { %v1768_v33 = vsel %vm1756_vm7, %v1730_v26, 0.0  ;;  %v1699_v13 = vsub.f32 %v3270_v37, %v1495_v60 }
 0x1f6   : > { %v1769_v46 = vadd.f32 %v1768_v33, %v1767_v0 }
 0x1f7   : > { %v1731_v55 = vmul.f32 %v1699_v13, %v1667_v40  ;;  %v3358_v50 = vpop.xlane.xlu1 %1448  ;;  %v2092_v13 = vsel %vm1565_vm1, 1.0, %v3693_v44 }
 0x1f8   : > { %v1497_v63 = vpop.xlane.xlu0 %1496  ;;  %v1673_v5 = vmul.f32 %v2092_v13, %v3292_v15 }
 0x1f9   : > { %v1770_v1 = vsel %vm1756_vm7, %v1731_v55, 0.0  ;;  %v1700_v10 = vsub.f32 %v3272_v18, %v1497_v63 }
 0x1fa   : > { %v1771_v37 = vadd.f32 %v1770_v1, %v1769_v46 }
 0x1fb   : > { %v1732_v6 = vmul.f32 %v1700_v10, %v1668_v19  ;;  %v3366_v59 = vpop.xlane.xlu1 %1450  ;;  %v576_v19 = vld [vmem:[%s3278_s27 + $0x1] sm:$0x1]  ;;  %s3754_s27 = sld [smem:[#allocation36_spill]] }
 0x1fc   : > { %1542 = vadd.xlane.f32.xlu0 %v3214_v43  ;;  %v1499_v2 = vpop.xlane.xlu0 %1498  ;;  %vm578_vm4 = vcmp.eq.s32.totalorder %v576_v19, 0 }
 0x1fd   : > { %v1772_v20 = vsel %vm1756_vm7, %v1732_v6, 0.0  ;;  %v1701_v56 = vsub.f32 %v3281_v49, %v1499_v2 }
 0x1fe   : > { %v1773_v18 = vadd.f32 %v1772_v20, %v1771_v37  ;;  %v2093_v37 = vsel %vm1566_vm2, 1.0, %v3693_v44 }
 0x1ff   : > { %v1733_v7 = vmul.f32 %v1701_v56, %v1669_v62  ;;  %v3376_v3 = vpop.xlane.xlu1 %1452  ;;  %v3408_v62 = vrot.slane %v3308_v58, %v2907_v16  ;;  %v1674_v20 = vmul.f32 %v2093_v37, %v3292_v15 }
 0x200   : > { %v1501_v53 = vpop.xlane.xlu0 %1500 }
 0x201   : > { %v1774_v43 = vsel %vm1756_vm7, %v1733_v7, 0.0  ;;  %v1702_v30 = vsub.f32 %v3289_v9, %v1501_v53  ;;  %v2074_v7 = vsel %vm578_vm4, 1.0, %v3693_v44  ;;  %vm1568_vm5 = vcmp.lt.s32.totalorder %v2900_v11, %v3408_v62  ;;  %s3632_s14 = scalar_lea.hbm %s3754_s27, %s2112_s29 }
 0x202   : > { %v1775_v49 = vadd.f32 %v1774_v43, %v1773_v18  ;;  %v2094_v18 = vsel %vm1567_vm3, 1.0, %v3693_v44  ;;  %v3421_v43 = vrot.slane %v2074_v7, %v2907_v16  ;;  %vm1569_vm6 = vcmp.lt.s32.totalorder %v2903_v12, %v3408_v62  ;;  %v3442_v12 = vld [vmem:[%s563_s15 + $0x1] sm:$0x1] }
 0x203   : > { %v1734_v34 = vmul.f32 %v1702_v30, %v1670_v41  ;;  %v3389_v9 = vpop.xlane.xlu1 %1454  ;;  %v1675_v27 = vmul.f32 %v2094_v18, %v3292_v15  ;;  %vm1570_vm8 = vcmp.lt.s32.totalorder %v2910_v17, %v3408_v62  ;;  %v3695_v19 = vsub.f32 0.0, %v3442_v12 }
 0x204   : > { %v1503_v38 = vpop.xlane.xlu0 %1502  ;;  %vm1571_vm9 = vcmp.lt.s32.totalorder %v2915_v24, %v3408_v62  ;;  %vm1572_vm10 = vcmp.lt.s32.totalorder %v2922_v28, %v3408_v62  ;;  %v803_v18 = vand.u32 2147483647, %v3442_v12  ;;  %vm1573_vm11 = vcmp.lt.s32.totalorder %v2932_v32, %v3408_v62  ;;  %v2132_v32 = vld [vmem:[%s454_s18] sm:$0xff]  }
 0x205   : > { %v1776_v0 = vsel %vm1756_vm7, %v1734_v34, 0.0  ;;  %v1703_v26 = vsub.f32 %v3301_v25, %v1503_v38  ;;  %vm1574_vm15 = vcmp.lt.s32.totalorder %v2939_v36, %v3408_v62  ;;  %vm1575_vm0 = vcmp.lt.s32.totalorder %v2944_v39, %v3408_v62 }
 0x206   : > { %v1777_v40 = vadd.f32 %v1776_v0, %v1775_v49  ;;  %v2095_v49 = vsel %vm1568_vm5, 1.0, %v3693_v44  ;;  %vm1576_vm1 = vcmp.lt.s32.totalorder %v2951_v42, %v3408_v62  ;;  %vm1577_vm2 = vcmp.lt.s32.totalorder %v2961_v48, %v3408_v62 }
 0x207   : > { %v1735_v60 = vmul.f32 %v1703_v26, %v1671_v21  ;;  %v3399_v1 = vpop.xlane.xlu1 %1456  ;;  %v1676_v15 = vmul.f32 %v2095_v49, %v3421_v43  ;;  %v2096_v26 = vsel %vm1569_vm6, 1.0, %v3693_v44  ;;  %vm1578_vm3 = vcmp.lt.s32.totalorder %v2956_v45, %v3408_v62 }
 0x208   : > { %v1505_v33 = vpop.xlane.xlu0 %1504  ;;  %v1677_v13 = vmul.f32 %v2096_v26, %v3421_v43  ;;  %v2100_v26 = vsel %vm1573_vm11, 1.0, %v3693_v44  ;;  %vm1579_vm4 = vcmp.lt.s32.totalorder %v2971_v54, %v3408_v62  ;;  %vm1580_vm5 = vcmp.lt.s32.totalorder %v2966_v51, %v3408_v62  ;;  %v3740_v51 = vld [vmem:[#allocation23_spill] sm:$0xff] }
 0x209   : > { %v1778_v46 = vsel %vm1756_vm7, %v1735_v60, 0.0  ;;  %v1704_v55 = vsub.f32 %v3315_v29, %v1505_v33  ;;  %vm1581_vm6 = vcmp.lt.s32.totalorder %v3740_v51, %v3408_v62 }
 0x20a   : > { %v1779_v25 = vadd.f32 %v1778_v46, %v1777_v40  ;;  %v3436_v40 = vld [vmem:[%s563_s15] sm:$0x1]  ;;  %s2510_s15 = scalar_lea.vmem %s1863_s22, 128 }
 0x20b   : > { %v1736_v63 = vmul.f32 %v1704_v55, %v1672_v52  ;;  %v3696_v46 = vsub.f32 0.0, %v3436_v40  ;;  %v802_v24 = vand.u32 2147483647, %v3436_v40  ;;  %p2511_p10 = scmp.ne.s32.totalorder %s1863_s22, %s2510_s15 }
 0x20c   : > { %v1507_v10 = vpop.xlane.xlu0 %1506 }
 0x20d   : > { %v1780_v6 = vsel %vm1756_vm7, %v1736_v63, 0.0  ;;  %v1705_v29 = vsub.f32 %v3328_v8, %v1507_v10  ;;  %v3417_v8 = vpop.xlane.xlu1 %1458  ;;  %v804_v49 = vsub.f32 0.0, %v802_v24  ;;  %v2211_v24 = vld [vmem:[%s445_s25 + $0x8] sm:$0xff]   ;;  %p2512_p3 = pnand %p2511_p10, %p3755_p1 }
 0x20e   : > { %v1781_v2 = vadd.f32 %v1780_v6, %v1779_v25  ;;  %v2097_v25 = vsel %vm1570_vm8, 1.0, %v3693_v44  ;;  %v780_v6 = vand.u32 2147483647, %v3696_v46 }
 0x20f   : > { %v1737_v14 = vmul.f32 %v1705_v29, %v1673_v5  ;;  %v1678_v37 = vmul.f32 %v2097_v25, %v3421_v43  ;;  %p2513_p9 = pneg %p2512_p3 }
 0x210   : > { %v1509_v56 = vpop.xlane.xlu0 %1508 }
 0x211   : > { %v1782_v47 = vsel %vm1756_vm7, %v1737_v14, 0.0  ;;  %v1706_v41 = vsub.f32 %v3338_v31, %v1509_v56  ;;  %v3433_v22 = vpop.xlane.xlu1 %1460  ;;  %v781_v14 = vand.u32 2147483647, %v3695_v19 }
 0x212   : > { %v1783_v58 = vadd.f32 %v1782_v47, %v1781_v2  ;;  %v2098_v2 = vsel %vm1571_vm9, 1.0, %v3693_v44 }
 0x213   : > { %v1738_v53 = vmul.f32 %v1706_v41, %v1674_v20  ;;  %v1679_v47 = vmul.f32 %v2098_v2, %v3421_v43  ;;  %v782_v41 = vsub.f32 0.0, %v780_v6  ;;  %v2212_v6 = vld [vmem:[%s454_s18 + $0x8] sm:$0xff]   ;;  %s568_s18 = scalar_lea.vmem %s3676_s7, %s3766_s17 }
 0x214   : > { %v1511_v30 = vpop.xlane.xlu0 %1510  ;;  %v2213_v2 = vld [vmem:[%s463_s28 + $0x8] sm:$0xff]   ;;  %v773_v57 = vld [vmem:[%s568_s18 + $0x1] sm:$0x1] }
 0x215   : > { %v1784_v34 = vsel %vm1756_vm7, %v1738_v53, 0.0  ;;  %v1707_v21 = vsub.f32 %v3350_v23, %v1511_v30  ;;  %v3452_v17 = vpop.xlane.xlu1 %1462  ;;  %v783_v30 = vsub.f32 0.0, %v781_v14 }
 0x216   : > { %v1785_v31 = vadd.f32 %v1784_v34, %v1783_v58 }
 0x217   : > { %v1739_v38 = vmul.f32 %v1707_v21, %v1675_v27  ;;  %v2099_v27 = vsel %vm1572_vm10, 1.0, %v3693_v44  ;;  %v805_v21 = vsub.f32 0.0, %v803_v18 }
 0x218   : > { %v1513_v0 = vpop.xlane.xlu0 %1512 }
 0x219   : > { %v1786_v23 = vsel %vm1756_vm7, %v1739_v38, 0.0  ;;  %v1708_v60 = vsub.f32 %v3358_v50, %v1513_v0  ;;  %v3467_v58 = vpop.xlane.xlu1 %1464  ;;  %v1680_v38 = vmul.f32 %v2099_v27, %v3421_v43  ;;  %v808_v25 = vmul.f32 1.442695, %v805_v21 }
 0x21a   : > { %v1787_v52 = vadd.f32 %v1786_v23, %v1785_v31  ;;  %v786_v23 = vmul.f32 1.442695, %v783_v30 }
 0x21b   : > { %v1740_v33 = vmul.f32 %v1708_v60, %v1676_v15  ;;  %v784_v15 = vmul.f32 1.442695, %v782_v41  ;;  %v2137_v41 = vunpack.c.l.bf16 %v2212_v6 }
 0x21c   : > { %v1515_v55 = vpop.xlane.xlu0 %1514 }
 0x21d   : > { %v1788_v63 = vsel %vm1756_vm7, %v1740_v33, 0.0  ;;  %v1709_v50 = vsub.f32 %v3366_v59, %v1515_v55  ;;  %v806_v33 = vmul.f32 1.442695, %v804_v49  ;;  %2380 = vpow2.f32 %v784_v15 }
 0x21e   : > { %v1789_v5 = vadd.f32 %v1788_v63, %v1787_v52  ;;  %v2140_v52 = vld [vmem:[%s463_s28] sm:$0xff]   ;;  %2382 = vpow2.f32 %v786_v23  ;;  %v2129_v49 = vunpack.c.l.bf16 %v2211_v24 }
 0x21f   : > { %v1741_v10 = vmul.f32 %v1709_v50, %v1677_v13  ;;  %v3482_v13 = vpop.xlane.xlu1 %1466  ;;  %v1681_v50 = vmul.f32 %v2100_v26, %v3421_v43  ;;  %2384 = vpow2.f32 %v806_v33 }
 0x220   : > { %v1517_v29 = vpop.xlane.xlu0 %1516  ;;  %2386 = vpow2.f32 %v808_v25 }
 0x221   : > { %v1790_v59 = vsel %vm1756_vm7, %v1741_v10, 0.0  ;;  %v1710_v20 = vsub.f32 %v3376_v3, %v1517_v29  ;;  %v2141_v29 = vunpack.c.l.bf16 %v2140_v52 }
 0x222   : > { %v1791_v56 = vadd.f32 %v1790_v59, %v1789_v5  ;;  %v2124_v5 = vld [vmem:[%s445_s25] sm:$0xff]   ;;  %s2516_s25 = scalar_lea.vmem %s2515_s30, 256 }
 0x223   : > { %v1742_v7 = vmul.f32 %v1710_v20, %v1678_v37  ;;  %v2133_v37 = vunpack.c.l.bf16 %v2132_v32  ;;  %v2142_v20 = vunpack.c.h.bf16 %v2140_v52  ;;  %v2125_v18 = vunpack.c.l.bf16 %v2124_v5  ;;  %v3495_v27 = vpop.xlane.xlu1 %1468  ;;  %p2518_p12 = scmp.lt.s32.totalorder %s2516_s25, %s2510_s15 }
 0x224   : > { %v1519_v53 = vpop.xlane.xlu0 %1518 }
 0x225   : > { %v1792_v3 = vsel %vm1756_vm7, %v1742_v7, 0.0  ;;  %v1711_v28 = vsub.f32 %v3389_v9, %v1519_v53  ;;  %v2126_v7 = vunpack.c.h.bf16 %v2124_v5  ;;  %v2145_v53 = vunpack.c.l.bf16 %v2213_v2  ;;  %p2519_p0 = por %p2518_p12, %p2517_p6 }
 0x226   : > { %v1793_v34 = vadd.f32 %v1792_v3, %v1791_v56  ;;  %v2138_v3 = vunpack.c.h.bf16 %v2212_v6  ;;  %v633_v21 = vsub.f32 %v2133_v37, %v2141_v29  ;;  %v629_v15 = vsub.f32 %v2125_v18, %v2141_v29 }
 0x227   : > { %v1743_v31 = vmul.f32 %v1711_v28, %v1679_v47  ;;  %v2146_v28 = vunpack.c.h.bf16 %v2213_v2  ;;  %v635_v26 = vsub.f32 %v2137_v41, %v2145_v53  ;;  %p2520_p11 = pnand %p2519_p0, %p2513_p9 }
 0x228   : > { %v1521_v0 = vpop.xlane.xlu0 %1520  ;;  %v691_v52 = vand.u32 2147483647, %v633_v21  ;;  %v655_v25 = vmul.f32 %v633_v21, %v633_v21 }
 0x229   : > { %v1794_v60 = vsel %vm1756_vm7, %v1743_v31, 0.0  ;;  %v1712_v9 = vsub.f32 %v3399_v1, %v1521_v0  ;;  %v2134_v1 = vunpack.c.h.bf16 %v2132_v32  ;;  %v630_v0 = vsub.f32 %v2126_v7, %v2142_v20 }
 0x22a   : > { %v1795_v55 = vadd.f32 %v1794_v60, %v1793_v34  ;;  %v2130_v34 = vunpack.c.h.bf16 %v2211_v24  ;;  %v636_v60 = vsub.f32 %v2138_v3, %v2146_v28  ;;  %v2381_v37 = vpop.eup %2380 }
 0x22b   : > { %v1744_v63 = vmul.f32 %v1712_v9, %v1680_v38  ;;  %v634_v31 = vsub.f32 %v2134_v1, %v2142_v20  ;;  %v631_v9 = vsub.f32 %v2129_v49, %v2145_v53  ;;  %v674_v5 = vand.u32 2147483647, %v630_v0 }
 0x22c   : > { %v1523_v10 = vpop.xlane.xlu0 %1522  ;;  %v632_v32 = vsub.f32 %v2130_v34, %v2146_v28  ;;  %v694_v6 = vand.u32 2147483647, %v636_v60  ;;  %v638_v20 = vmul.f32 %v630_v0, %v630_v0  ;;  %v658_v53 = vmul.f32 %v636_v60, %v636_v60 }
 0x22d   : > { %v1796_v14 = vsel %vm1756_vm7, %v1744_v63, 0.0  ;;  %v1713_v59 = vsub.f32 %v3417_v8, %v1523_v10  ;;  %v692_v33 = vand.u32 2147483647, %v634_v31  ;;  %v656_v63 = vmul.f32 %v634_v31, %v634_v31 }
 0x22e   : > { %v1797_v56 = vadd.f32 %v1796_v14, %v1795_v55  ;;  %v3504_v55 = vpop.xlane.xlu1 %1470  ;;  %v693_v10 = vand.u32 2147483647, %v635_v26  ;;  %v675_v29 = vand.u32 2147483647, %v631_v9  ;;  %v676_v2 = vand.u32 2147483647, %v632_v32  ;;  %v2383_v14 = vpop.eup %2382 }
 0x22f   : > { %v1745_v47 = vmul.f32 %v1713_v59, %v1681_v50  ;;  %3729 = vst [vmem:[#allocation26_spill] sm:$0xff] %v3504_v55  ;;  %v673_v50 = vand.u32 2147483647, %v629_v15  ;;  %v637_v59 = vmul.f32 %v629_v15, %v629_v15  ;;  %v2385_v24 = vpop.eup %2384  ;;  %v659_v18 = vadd.f32 %v656_v63, %v655_v25 }
 0x230   : > { %v3497_v30 = vpop.xlane.xlu0 %1524  ;;  %v695_v7 = vadd.f32 %v692_v33, %v691_v52  ;;  %v2387_v41 = vpop.eup %2386  ;;  %v639_v3 = vmul.f32 %v631_v9, %v631_v9  ;;  %v640_v28 = vmul.f32 %v632_v32, %v632_v32  ;;  %v788_v49 = vadd.f32 1.0, %v2381_v37 }
 0x231   : > { %v1798_v8 = vsel %vm1756_vm7, %v1745_v47, 0.0  ;;  %v677_v47 = vadd.f32 %v674_v5, %v673_v50  ;;  %v702_v21 = vadd.f32 %v694_v6, %v693_v10  ;;  %v684_v31 = vadd.f32 %v676_v2, %v675_v29 }
 0x232   : > { %v3500_v38 = vadd.f32 %v1798_v8, %v1797_v56  ;;  %v657_v56 = vmul.f32 %v635_v26, %v635_v26  ;;  %v3508_v34 = vpop.xlane.xlu1 %1472  ;;  %v789_v44 = vadd.f32 1.0, %v2383_v14  ;;  %v810_v19 = vadd.f32 1.0, %v2385_v24 }
 0x233   : > { %3730 = vst [vmem:[#allocation27_spill] sm:$0xff] %v3508_v34  ;;  %v641_v15 = vadd.f32 %v638_v20, %v637_v59  ;;  %v696_v0 = vrot.slane %v695_v7, 4  ;;  %v678_v46 = vrot.slane %v677_v47, 4  ;;  %v811_v26 = vadd.f32 1.0, %v2387_v41 }
 0x234   : > { %3728 = vst [vmem:[#allocation25_spill] sm:$0xff] %v3500_v38  ;;  %v3502_v23 = vpop.xlane.xlu0 %1526  ;;  %v660_v25 = vrot.slane %v659_v18, 4  ;;  %v666_v52 = vadd.f32 %v658_v53, %v657_v56  ;;  %v648_v33 = vadd.f32 %v640_v28, %v639_v3  ;;  %2388 = vlog2.f32 %v788_v49 }
 0x235   : > { %v703_v9 = vrot.slane %v702_v21, 4  ;;  %v685_v32 = vrot.slane %v684_v31, 4  ;;  %2390 = vlog2.f32 %v789_v44  ;;  %v642_v50 = vrot.slane %v641_v15, 4 }
 0x236   : > { %2392 = vlog2.f32 %v810_v19  ;;  %v3514_v63 = vpop.xlane.xlu1 %1474  ;;  %v697_v5 = vadd.f32 %v696_v0, %v695_v7  ;;  %v661_v10 = vadd.f32 %v660_v25, %v659_v18  ;;  %v667_v37 = vrot.slane %v666_v52, 4 }
 0x237   : > { %3731 = vst [vmem:[#allocation28_spill] sm:$0xff] %v3514_v63  ;;  %2394 = vlog2.f32 %v811_v26  ;;  %v649_v6 = vrot.slane %v648_v33, 4  ;;  %v679_v29 = vadd.f32 %v678_v46, %v677_v47  ;;  %v704_v14 = vadd.f32 %v703_v9, %v702_v21 }
 0x238   : > { %v3506_v1 = vpop.xlane.xlu0 %1528  ;;  %v686_v59 = vadd.f32 %v685_v32, %v684_v31  ;;  %v643_v20 = vadd.f32 %v642_v50, %v641_v15  ;;  %v698_v24 = vrot.slane %v697_v5, 2  ;;  %v662_v56 = vrot.slane %v661_v10, 2 }
 0x239   : > { %v668_v41 = vadd.f32 %v667_v37, %v666_v52  ;;  %v650_v53 = vadd.f32 %v649_v6, %v648_v33  ;;  %v680_v44 = vrot.slane %v679_v29, 2  ;;  %v705_v7 = vrot.slane %v704_v14, 2 }
 0x23a   : > { %v3518_v19 = vpop.xlane.xlu1 %1476  ;;  %v687_v18 = vrot.slane %v686_v59, 2  ;;  %v644_v28 = vrot.slane %v643_v20, 2  ;;  %v699_v49 = vadd.f32 %v698_v24, %v697_v5  ;;  %v663_v46 = vadd.f32 %v662_v56, %v661_v10 }
 0x23b   : > { %3733 = vst [vmem:[#allocation30_spill] sm:$0xff] %v3518_v19  ;;  %v669_v47 = vrot.slane %v668_v41, 2  ;;  %v651_v0 = vrot.slane %v650_v53, 2  ;;  %v681_v21 = vadd.f32 %v680_v44, %v679_v29  ;;  %v706_v15 = vadd.f32 %v705_v7, %v704_v14  ;;  %v772_v14 = vld [vmem:[%s568_s18] sm:$0x1] }
 0x23c   : > { %v3510_v8 = vpop.xlane.xlu0 %1530  ;;  %v688_v26 = vadd.f32 %v687_v18, %v686_v59  ;;  %v645_v32 = vadd.f32 %v644_v28, %v643_v20  ;;  %v700_v50 = vrot.slane %v699_v49, 1  ;;  %v664_v5 = vrot.slane %v663_v46, 1 }
 0x23d   : > { %v670_v10 = vadd.f32 %v669_v47, %v668_v41  ;;  %v652_v6 = vadd.f32 %v651_v0, %v650_v53  ;;  %v682_v24 = vrot.slane %v681_v21, 1  ;;  %v707_v29 = vrot.slane %v706_v15, 1 }
 0x23e   : > { %v611_v33 = vpop.permute.xlu1 %610  ;;  %v689_v56 = vrot.slane %v688_v26, 1  ;;  %v3736_v59 = vsub.f32 0.0, %v3436_v40  ;;  %v3737_v7 = vsub.f32 0.0, %v3442_v12  ;;  %v800_v20 = vmax.f32 %v3436_v40, 0.0 }
 0x23f   : > { %v615_v11 = vrot.slane %v611_v33, %v2907_v16  ;;  %v801_v28 = vmax.f32 %v3442_v12, 0.0  ;;  %v671_v0 = vrot.slane %v670_v10, 1  ;;  %v646_v63 = vrot.slane %v645_v32, 1 }
 0x240   : > { %v3512_v60 = vpop.xlane.xlu0 %1532  ;;  %v778_v44 = vmax.f32 %v3736_v59, 0.0  ;;  %v779_v18 = vmax.f32 %v3737_v7, 0.0  ;;  %v683_v34 = vadd.f32 %v682_v24, %v681_v21  ;;  %v653_v59 = vrot.slane %v652_v6, 1 }
 0x241   : > { %v2389_v31 = vpop.eup %2388  ;;  %v708_v38 = vadd.f32 %v707_v29, %v706_v15  ;;  %v690_v7 = vadd.f32 %v689_v56, %v688_v26  ;;  %v774_v55 = vmul.f32 10.0, %v772_v14  ;;  %vm623_vm12 = vcmp.lt.s32.totalorder %v3006_v35, %v615_v11 }
 0x242   : > { %v2391_v25 = vpop.eup %2390  ;;  %v791_v19 = vmul.f32 0.6931472, %v2389_v31  ;;  %v775_v31 = vmul.f32 10.0, %v773_v57  ;;  %v798_v33 = vsub.f32 1.0, %v772_v14  ;;  %v799_v40 = vsub.f32 1.0, %v773_v57 }
 0x243   : > { %v2393_v52 = vpop.eup %2392  ;;  %v793_v41 = vmul.f32 0.6931472, %v2391_v25  ;;  %v647_v4 = vadd.f32 %v646_v63, %v645_v32  ;;  %v654_v26 = vadd.f32 %v653_v59, %v652_v6  ;;  %v755_v29 = vmul.f32 %v708_v38, %v708_v38 }
 0x244   : > { %v3516_v2 = vpop.xlane.xlu0 %1534  ;;  %v2395_v37 = vpop.eup %2394  ;;  %v813_v53 = vmul.f32 0.6931472, %v2393_v52  ;;  %v739_v11 = vmul.f32 %v690_v7, %v690_v7  ;;  %v1715_v39 = vsub.f32 %v3452_v17, %v3502_v23  ;;  %v1717_v17 = vsub.f32 %v3482_v13, %v3510_v8 }
 0x245   : > { %3732 = vst [vmem:[#allocation29_spill] sm:$0xff] %v3516_v2  ;;  %v815_v47 = vmul.f32 0.6931472, %v2395_v37  ;;  %v794_v2 = vadd.f32 %v791_v19, %v778_v44  ;;  %v795_v12 = vadd.f32 %v793_v41, %v779_v18  ;;  %v665_v37 = vadd.f32 %v664_v5, %v663_v46 }
 0x246   : > { %v816_v25 = vadd.f32 %v813_v53, %v800_v20  ;;  %v1718_v54 = vsub.f32 %v3495_v27, %v3512_v60  ;;  %v2108_v27 = vsel %vm1581_vm6, 1.0, %v3739_v61 }
 0x247   : > { %v817_v52 = vadd.f32 %v815_v47, %v801_v28  ;;  %v796_v56 = vmul.f32 %v794_v2, %v774_v55  ;;  %v797_v14 = vmul.f32 %v795_v12, %v775_v31  ;;  %v2102_v12 = vsel %vm1575_vm0, 1.0, %v3739_v61 }
 0x248   : > { %v3520_v3 = vpop.xlane.xlu0 %1536  ;;  %v818_v57 = vmul.f32 %v816_v25, %v798_v33  ;;  %v2101_v33 = vsel %vm1574_vm15, 1.0, %v3739_v61  ;;  %v1714_v25 = vsub.f32 %v3433_v22, %v3497_v30  ;;  %v1683_v36 = vmul.f32 %v2102_v12, %v3421_v43 }
 0x249   : > { %3734 = vst [vmem:[#allocation31_spill] sm:$0xff] %v3520_v3  ;;  %v819_v19 = vmul.f32 %v817_v52, %v799_v40  ;;  %v1682_v40 = vmul.f32 %v2101_v33, %v3421_v43  ;;  %v2103_v52 = vsel %vm1576_vm1, 1.0, %v3739_v61  ;;  %v1716_v30 = vsub.f32 %v3467_v58, %v3506_v1 }
 0x24a   : > { %v820_v6 = vadd.f32 %v818_v57, %v796_v56  ;;  %v1684_v42 = vmul.f32 %v2103_v52, %v3421_v43  ;;  %v1747_v45 = vmul.f32 %v1715_v39, %v1683_v36  ;;  %v3744_v56 = vld [vmem:[#allocation25_spill] sm:$0xff] }
 0x24b   : > { %v821_v38 = vadd.f32 %v819_v19, %v797_v14  ;;  %v1746_v22 = vmul.f32 %v1714_v25, %v1682_v40 }
 0x24c   : > { %v3526_v9 = vpop.xlane.xlu0 %1538  ;;  %v822_v47 = vsel %vm711_vm14, %v820_v6, 0.0  ;;  %v1748_v1 = vmul.f32 %v1716_v30, %v1684_v42  ;;  %v1802_v13 = vsel %vm1756_vm7, %v1747_v45, 0.0  ;;  %v3748_v6 = vld [vmem:[#allocation28_spill] sm:$0xff] }
 0x24d   : > { %3735 = vst [vmem:[#allocation32_spill] sm:$0xff] %v3526_v9  ;;  %v701_v9 = vadd.f32 %v700_v50, %v699_v49  ;;  %v2075_v49 = vsel %vm623_vm12, 1.0, %v3739_v61  ;;  %v672_v50 = vadd.f32 %v671_v0, %v670_v10  ;;  %v823_v0 = vsel %vm711_vm14, %v821_v38, 0.0 }
 0x24e   : > { %v724_v44 = vmul.f32 %v2075_v49, %v665_v37  ;;  %v709_v46 = vmul.f32 %v2075_v49, %v647_v4  ;;  %v824_v31 = vadd.f32 %v823_v0, %v822_v47  ;;  %v2104_v37 = vsel %vm1577_vm2, 1.0, %v3739_v61 }
 0x24f   : > { %v754_v24 = vmul.f32 %v701_v9, %v701_v9  ;;  %v1685_v48 = vmul.f32 %v2104_v37, %v3421_v43  ;;  %v1800_v58 = vsel %vm1756_vm7, %v1746_v22, 0.0  ;;  %v1804_v60 = vsel %vm1756_vm7, %v1748_v1, 0.0 }
 0x250   : > { %v3535_v3 = vpop.xlane.xlu0 %1540  ;;  %v726_v55 = vsel %vm711_vm14, %v724_v44, 0.0  ;;  %v712_v18 = vsel %vm711_vm14, %v709_v46, 0.0  ;;  %v1801_v14 = vadd.f32 %v1800_v58, %v3744_v56  ;;  %v3745_v44 = vld [vmem:[#allocation31_spill] sm:$0xff] }
 0x251   : > { %3738 = vst [vmem:[#allocation33_spill] sm:$0xff] %v3535_v3  ;;  %v738_v3 = vmul.f32 %v683_v34, %v683_v34  ;;  %v756_v10 = vmul.f32 %v2075_v49, %v754_v24  ;;  %v3741_v24 = vld [vmem:[#allocation24_spill] sm:$0xff]  ;;  %v1749_v8 = vmul.f32 %v1717_v17, %v1685_v48  ;;  %v3746_v46 = vld [vmem:[#allocation27_spill] sm:$0xff] }
 0x252   : > { %vm1582_vm8 = vcmp.lt.s32.totalorder %v3741_v24, %v3408_v62 }
 0x258   : > { %v618_v21 = vpop.permute.xlu0 %617 }
 0x259   : > { %v622_v15 = vrot.slane %v618_v21, %v2907_v16  ;;  %v740_v16 = vmul.f32 %v2075_v49, %v738_v3  ;;  %v758_v3 = vsel %vm711_vm14, %v756_v10, 0.0  ;;  %v2105_v49 = vsel %vm1578_vm3, 1.0, %v3739_v61 }
 0x25a   : > { %v1686_v23 = vmul.f32 %v2105_v49, %v3421_v43  ;;  %v2106_v21 = vsel %vm1579_vm4, 1.0, %v3739_v61  ;;  %v1689_v10 = vmul.f32 %v2108_v27, %v3421_v43 }
 0x25b   : > { %vm624_vm13 = vcmp.lt.s32.totalorder %v3006_v35, %v622_v15  ;;  %v742_v53 = vsel %vm711_vm14, %v740_v16, 0.0  ;;  %v1687_v15 = vmul.f32 %v2106_v21, %v3421_v43  ;;  %v3747_v16 = vld [vmem:[#allocation32_spill] sm:$0xff] }
 0x25c   : > { %v2076_v63 = vsel %vm624_vm13, 1.0, %v3739_v61  ;;  %v1750_v19 = vmul.f32 %v1718_v54, %v1686_v23  ;;  %v1721_v38 = vsub.f32 %v3748_v6, %v3747_v16 }
 0x25d   : > { %v725_v32 = vmul.f32 %v2076_v63, %v672_v50  ;;  %v710_v5 = vmul.f32 %v2076_v63, %v654_v26  ;;  %v757_v9 = vmul.f32 %v2076_v63, %v755_v29  ;;  %v741_v34 = vmul.f32 %v2076_v63, %v739_v11  ;;  %v3742_v26 = vld [vmem:[#allocation29_spill] sm:$0xff]  ;;  %v3743_v29 = vld [vmem:[#allocation26_spill] sm:$0xff] }
 0x25e   : > { %v2107_v50 = vsel %vm1580_vm5, 1.0, %v3739_v61  ;;  %v1719_v11 = vsub.f32 %v3743_v29, %v3742_v26  ;;  %v1720_v63 = vsub.f32 %v3746_v46, %v3745_v44  ;;  %v1753_v47 = vmul.f32 %v1721_v38, %v1689_v10 }
 0x25f   : > { %v727_v2 = vsel %vm711_vm14, %v725_v32, 0.0  ;;  %v713_v35 = vsel %vm711_vm14, %v710_v5, 0.0  ;;  %v759_v28 = vsel %vm711_vm14, %v757_v9, 0.0  ;;  %v743_v41 = vsel %vm711_vm14, %v741_v34, 0.0 }
 0x260   : > { %v728_v4 = vadd.f32 %v727_v2, %v726_v55  ;;  %v714_v20 = vadd.f32 %v713_v35, %v712_v18  ;;  %v760_v59 = vadd.f32 %v759_v28, %v758_v3  ;;  %v744_v7 = vadd.f32 %v743_v41, %v742_v53  ;;  %v3751_v41 = vld [vmem:[#allocation22_spill] sm:$0xff] }
 0x261   : > { %v1688_v57 = vmul.f32 %v2107_v50, %v3421_v43  ;;  %v2109_v32 = vsel %vm1582_vm8, 1.0, %v3739_v61  ;;  %v1803_v5 = vadd.f32 %v1802_v13, %v1801_v14  ;;  %v1806_v9 = vsel %vm1756_vm7, %v1749_v8, 0.0 }
 0x262   : > { %729 = vadd.xlane.f32.xlu0 %v728_v4  ;;  %715 = vadd.xlane.f32.xlu1 %v714_v20  ;;  %v1751_v34 = vmul.f32 %v1719_v11, %v1687_v15  ;;  %v1690_v2 = vmul.f32 %v2109_v32, %v3421_v43  ;;  %v1808_v18 = vsel %vm1756_vm7, %v1750_v19, 0.0  ;;  %v3749_v4 = vld [vmem:[#allocation33_spill] sm:$0xff]  ;;  %v3750_v20 = vld [vmem:[#allocation30_spill] sm:$0xff]  ;;  %vm1583_vm9 = vcmp.lt.s32.totalorder %v3751_v41, %v3408_v62 }
 0x263   : > { %v1805_v55 = vadd.f32 %v1804_v60, %v1803_v5  ;;  %v1752_v35 = vmul.f32 %v1720_v63, %v1688_v57  ;;  %v1722_v28 = vsub.f32 %v3750_v20, %v3749_v4  ;;  %v1814_v40 = vsel %vm1756_vm7, %v1753_v47, 0.0 }
 0x264   : > { %v1810_v53 = vsel %vm1756_vm7, %v1751_v34, 0.0  ;;  %v1479_v52 = vpop.xlane.xlu1 %1478 }
 0x265   : > { %v1807_v3 = vadd.f32 %v1806_v9, %v1805_v55 }
 0x266   : > { %761 = vadd.xlane.f32.xlu0 %v760_v59  ;;  %745 = vadd.xlane.f32.xlu1 %v744_v7  ;;  %v2110_v59 = vsel %vm1583_vm9, 1.0, %v3739_v61  ;;  %v1812_v7 = vsel %vm1756_vm7, %v1752_v35, 0.0 }
 0x267   : > { %v1809_v0 = vadd.f32 %v1808_v18, %v1807_v3  ;;  %v1691_v12 = vmul.f32 %v2110_v59, %v3421_v43 }
 0x269   : > { %v1811_v33 = vadd.f32 %v1810_v53, %v1809_v0 }
 0x26a   : > { %825 = vadd.xlane.f32.xlu1 %v824_v31  ;;  %v1754_v31 = vmul.f32 %v1722_v28, %v1690_v2  ;;  %v3752_v28 = vld [vmem:[#allocation21_spill] sm:$0xff] }
 0x26b   : > { %v1813_v25 = vadd.f32 %v1812_v7, %v1811_v33  ;;  %vm1832_vm10 = vcmp.eq.s32.totalorder %v3752_v28, 1  ;;  %vm1835_vm11 = vcmp.eq.s32.totalorder %v3752_v28, 2  ;;  %vm1838_vm12 = vcmp.eq.s32.totalorder %v3752_v28, 3 }
 0x26c   : > { %v1816_v62 = vsel %vm1756_vm7, %v1754_v31, 0.0  ;;  %vm1841_vm13 = vcmp.eq.s32.totalorder %v3752_v28, 4  ;;  %vm1844_vm14 = vcmp.eq.s32.totalorder %v3752_v28, 5 }
 0x26d   : > { %v1815_v42 = vadd.f32 %v1814_v40, %v1813_v25 }
 0x26f   : > { %v1817_v49 = vadd.f32 %v1816_v62, %v1815_v42 }
 0x285   : > { %v1543_v36 = vpop.xlane.xlu0 %1542 }
 0x286   : > { %v1723_v39 = vsub.f32 %v1479_v52, %v1543_v36 }
 0x288   : > { %v1755_v37 = vmul.f32 %v1723_v39, %v1691_v12 }
 0x28a   : > { %v1818_v22 = vsel %vm1756_vm7, %v1755_v37, 0.0  ;;  %vm1829_vm7 = vcmp.eq.s32.totalorder %v3752_v28, 0 }
 0x28b   : > { %v1819_v61 = vadd.f32 %v1818_v22, %v1817_v49 }
 0x28d   : > { %1820 = vadd.xlane.f32.xlu0 %v1819_v61 }
 0x2eb   : > { %v716_v30 = vpop.xlane.xlu1 %715  ;;  %v730_v45 = vpop.xlane.xlu0 %729 }
 0x2ec   : > { %v717_v48 = vrot.slane %v716_v30, 4  ;;  %v731_v17 = vrot.slane %v730_v45, 4 }
 0x2ee   : > { %v718_v23 = vadd.f32 %v717_v48, %v716_v30  ;;  %v732_v21 = vadd.f32 %v731_v17, %v730_v45 }
 0x2ef   : > { %v746_v43 = vpop.xlane.xlu1 %745  ;;  %v762_v50 = vpop.xlane.xlu0 %761 }
 0x2f0   : > { %v719_v58 = vrot.slane %v718_v23, 2  ;;  %v733_v1 = vrot.slane %v732_v21, 2  ;;  %v747_v54 = vrot.slane %v746_v43, 4  ;;  %v763_v51 = vrot.slane %v762_v50, 4 }
 0x2f2   : > { %v748_v24 = vadd.f32 %v747_v54, %v746_v43  ;;  %v764_v13 = vadd.f32 %v763_v51, %v762_v50  ;;  %v720_v8 = vadd.f32 %v719_v58, %v718_v23  ;;  %v734_v15 = vadd.f32 %v733_v1, %v732_v21 }
 0x2f3   : > { %v826_v26 = vpop.xlane.xlu1 %825 }
 0x2f4   : > { %v749_v29 = vrot.slane %v748_v24, 2  ;;  %v765_v11 = vrot.slane %v764_v13, 2  ;;  %v827_v56 = vrot.slane %v826_v26, 4  ;;  %v721_v14 = vrot.slane %v720_v8, 1 }
 0x2f5   : > { %v735_v57 = vrot.slane %v734_v15, 1 }
 0x2f6   : > { %v828_v27 = vadd.f32 %v827_v56, %v826_v26  ;;  %v722_v60 = vadd.f32 %v721_v14, %v720_v8  ;;  %v750_v19 = vadd.f32 %v749_v29, %v748_v24  ;;  %v766_v44 = vadd.f32 %v765_v11, %v764_v13 }
 0x2f7   : > { %v736_v46 = vadd.f32 %v735_v57, %v734_v15 }
 0x2f8   : > { %v829_v63 = vrot.slane %v828_v27, 2  ;;  %2229 = vpush %v722_v60  ;;  %v751_v32 = vrot.slane %v750_v19, 1  ;;  %v767_v5 = vrot.slane %v766_v44, 1 }
 0x2f9   : > { %2231 = vpush %v736_v46 }
 0x2fa   : > { %v830_v9 = vadd.f32 %v829_v63, %v828_v27  ;;  %v752_v34 = vadd.f32 %v751_v32, %v750_v19  ;;  %v768_v10 = vadd.f32 %v767_v5, %v766_v44 }
 0x2fc   : > { %2233 = vpush %v752_v34  ;;  %v831_v16 = vrot.slane %v830_v9, 1 }
 0x2fd   : > { %2235 = vpush %v768_v10 }
 0x2fe   : > { %v832_v6 = vadd.f32 %v831_v16, %v830_v9 }
 0x300   : > { %2237 = vpush %v832_v6 }
 0x316   : > { %v1821_v38 = vpop.xlane.xlu0 %1820 }
 0x317   : > { %v1822_v55 = vrot.slane %v1821_v38, 4 }
 0x319   : > { %v1823_v2 = vadd.f32 %v1822_v55, %v1821_v38 }
 0x31b   : > { %v1824_v18 = vrot.slane %v1823_v2, 2 }
 0x31d   : > { %v1825_v35 = vadd.f32 %v1824_v18, %v1823_v2 }
 0x31f   : > { %v1826_v4 = vrot.slane %v1825_v35, 1 }
 0x321   : > { %v1827_v20 = vadd.f32 %v1826_v4, %v1825_v35 }
 0x323   : > { %2239 = vpush %v1827_v20 }
 0x329   : > { %s2230_s4 = spop %2229 }
 0x32a   : > { %v1830_v41 = vstv %s2230_s4  ;;  %s2232_s28 = spop %2231 }
 0x32b   : > { %v1831_v3 = vsel %vm1829_vm7, %v1830_v41, 0.0  ;;  %v1833_v53 = vstv %s2232_s28 }
 0x32c   : > { %v1834_v0 = vsel %vm1832_vm10, %v1833_v53, %v1831_v3 }
 0x32d   : > { %s2234_s23 = spop %2233 }
 0x32e   : > { %v1836_v47 = vstv %s2234_s23  ;;  %s2236_s17 = spop %2235 }
 0x32f   : > { %v1837_v59 = vsel %vm1835_vm11, %v1836_v47, %v1834_v0  ;;  %v1839_v7 = vstv %s2236_s17 }
 0x330   : > { %v1840_v33 = vsel %vm1838_vm12, %v1839_v7, %v1837_v59 }
 0x331   : > { %s2238_s21 = spop %2237 }
 0x332   : > { %v1842_v31 = vstv %s2238_s21 }
 0x333   : > { %v1843_v40 = vsel %vm1841_vm13, %v1842_v31, %v1840_v33 }
 0x354   : > { %s2240_s3 = spop %2239 }
 0x355   : > { %v1845_v12 = vstv %s2240_s3 }
 0x356   : > { %v1846_v25 = vsel %vm1844_vm14, %v1845_v12, %v1843_v40 }
 0x357   : > { %1847 = vst [vmem:[%s541_s9] sm:$0xff] %v1846_v25 }
 0x358   : > { %2523 = shalt.err (!%p2520_p11)
}
 0x359   : > { %s2524_s18 = scalar_lea.hbm %s3632_s14, 128  ;;  %s2528_s28 = scalar_lea.hbm %s3754_s27, 256 }
 0x35a   : > { %p2525_p4 = scmp.ne.s32.totalorder %s3632_s14, %s2524_s18  ;;  %p2529_p2 = scmp.lt.s32.totalorder %s3632_s14, %s3754_s27 }
 0x35b   : > { %p2530_p8 = scmp.lt.s32.totalorder %s2528_s28, %s2524_s18 }
 0x35c   : > { %p2526_p5 = pnand %p2525_p4, %p3755_p1 }
 0x35d   : > { %p2531_p13 = por %p2530_p8, %p2529_p2 }
 0x35e   : > { %p2527_p7 = pneg %p2526_p5 }
 0x360   : > { %p2532_p10 = pnand %p2531_p13, %p2527_p7 }
 0x362   : > { %2535 = shalt.err (!%p2532_p10)
}
 0x363   : > { %2249 = dma.vmem_to_hbm [thread:$0]  (%p3755_p1), %s1863_s22, 128, %s3632_s14, %s1849_s26  }
 0x364 PF: > { %s3756_s17 = sld [smem:[#allocation15_spill]]  ;;  %p3759_p9 = scmp.ge.s32.totalorder %s2582_s12, 2 }
 0x365   : > { %s3757_s21 = sld [smem:[#allocation20_spill]] }
 0x36a   : > { %s1874_s29 = sand.u32 1, %s3756_s17  }
 0x36b   : > { %p3758_p3 = scmp.ne.s32.totalorder %s3757_s21, 0  ;;  %s1875_s9 = scalar_lea.sflag [#allocation4], %s1874_s29 }
 0x36d   : > { %p2265_p6 = pnand %p3759_p9, %p3758_p3 }
 0x36f   : > { %p2266_p12 = pneg %p2265_p6 }
 0x371   : > { %2565 = dma.done.wait (%p2266_p12), %s1875_s9, 128  }
 0x372   : > { %2567 = vsyncadd (%p2266_p12), %s1875_s9, 4294967168  ;;  %s3760_s12 = sld [smem:[#allocation17_spill]]  ;;  %s3763_s30 = smov %s2574_s10 }
 0x373   : > { %s3761_s3 = sld [smem:[#allocation16_spill]] }
 0x374   : > { %s3762_s11 = sld [smem:[#allocation18_spill]] }
 0x378   : > { %p28_p0 = scmp.ge.s32.totalorder %s3760_s12, 4  }
 0x379   : > { %s3764_s10 = smov %s3761_s3 }
 0x37a   :  { %30 = sbr.rel (!%p28_p0) target bundleno = 13 (0xd), region = 153 }
 0x37f   :  { %1880 = vsyncpa [#allocation3], 1 }
 0x380   :  { %1882 = vsyncpa [#allocation3 + $0x1], 1 }
 0x381   :  { %1883 = vsyncpa [#allocation6], 1 }
 0x382   :  { %1885 = vsyncpa [#allocation6 + $0x1], 1 }
 0x383   :  { %1886 = vsyncpa [#allocation9], 1 }
 0x384   :  { %1888 = vsyncpa [#allocation9 + $0x1], 1 }
 0x385   :  { %1889 = vsyncpa [#allocation4], 1 }
 0x386   :  { %1891 = vsyncpa [#allocation4 + $0x1], 1 }

</bundles_post_ra>
